<compile_context>
chip_gen: v5e
topology: v5e:2x2
jax: 0.10.0
libtpu: 0.0.40
codegen_flags: <defaults>
</compile_context>

<pallas_src>
import functools

import jax
import jax.numpy as jnp
from jax.experimental import pallas as pl
from jax.experimental.pallas import tpu as pltpu


# --------------------------------------------------------------------------
# Fused MHA kernel: one grid step = one (batch b, query tile qi)
# --------------------------------------------------------------------------
def mha_kernel(q_ref, k_ref, v_ref, *rest, num_heads, head_dim, has_bias):
    """All MXU contractions are full-width 2-D matmuls on bf16 operands with f32
    accumulation. Per-head work (scores / P@V) uses static lane slices of the flat
    (N, C) projections, so no reshapes/transposes/broadcasts are needed in-kernel.
    K/V projections are computed once per batch (qi == 0) and carried in VMEM scratch
    across all query tiles of that batch."""
    if has_bias:
        (bias_ref, wq_ref, wk_ref, wv_ref, wp_ref, bp_ref,
         o_ref, kp_scr, vp_scr) = rest
    else:
        bias_ref = None
        (wq_ref, wk_ref, wv_ref, wp_ref, bp_ref,
         o_ref, kp_scr, vp_scr) = rest

    H, Dh = num_heads, head_dim
    f32, bf16 = jnp.float32, jnp.bfloat16

    # ---- K/V projections hoisted out of the query-tile axis -------------------------
    @pl.when(pl.program_id(1) == 0)
    def _project_kv():
        k2 = k_ref[0].astype(bf16)                                       # (Nk, C)
        v2 = v_ref[0].astype(bf16)
        kp_scr[...] = jnp.dot(k2, wk_ref[...],
                              preferred_element_type=f32).astype(bf16)   # (Nk, C)
        vp_scr[...] = jnp.dot(v2, wv_ref[...],
                              preferred_element_type=f32).astype(bf16)   # (Nk, C)

    # ---- Q projection: one lane-dense (tq, C) @ (C, C) matmul (scale folded in Wq) --
    qp = jnp.dot(q_ref[0].astype(bf16), wq_ref[...],
                 preferred_element_type=f32).astype(bf16)                # (tq, C)

    kp = kp_scr[...]                                                     # (Nk, C) bf16
    vp = vp_scr[...]                                                     # (Nk, C) bf16
    bias = bias_ref[0] if has_bias else None                             # (1, Nk) 0/-inf

    # ---- Per-head attention core (the Dh / Nk contractions are intrinsically per
    #      head); static lane slices keep every matmul a plain 2-D MXU op ------------
    nt_dims = (((1,), (1,)), ((), ()))                                   # A @ B^T
    ctx_parts = []
    for h in range(H):
        sl = slice(h * Dh, (h + 1) * Dh)
        s = jax.lax.dot_general(qp[:, sl], kp[:, sl], nt_dims,
                                preferred_element_type=f32)              # (tq, Nk) f32
        if has_bias:
            s = s + bias                                                 # key-padding bias
        s = s - jnp.max(s, axis=-1, keepdims=True)                       # f32 softmax
        p = jnp.exp(s)
        denom = jnp.sum(p, axis=-1, keepdims=True)                       # (tq, 1) f32
        ctx_h = jnp.dot(p.astype(bf16), vp[:, sl],
                        preferred_element_type=f32)                      # (tq, Dh) f32
        # Normalize the small context instead of the (tq, Nk) probability matrix.
        ctx_parts.append(ctx_h * pl.reciprocal(denom, approx=True))
    ctx = jnp.concatenate(ctx_parts, axis=-1)                            # (tq, C) head-major

    # ---- Output projection: one fused lane-dense (tq, C) @ (C, C) matmul + bias ----
    out = jnp.dot(ctx.astype(bf16), wp_ref[...], preferred_element_type=f32)
    out = out + bp_ref[...]
    o_ref[0] = out.astype(o_ref.dtype)


# --------------------------------------------------------------------------
# VMEM-aware query-tile choice (handles non-divisible Nq via padding)
# --------------------------------------------------------------------------
def _choose_q_tile(nq, nk, c):
    """Largest query tile whose per-step working set stays well within the smallest-VMEM
    generation (v7x: 64 MiB physical), preferring the candidate that minimizes padding."""
    budget = 12 * 1024 * 1024

    def est(t):                       # rough per-step VMEM bytes
        return (4 * t * nk            # f32 scores/probs for one head (reused across heads)
                + 3 * 4 * t * c       # qp / ctx / out slabs (f32)
                + 2 * 2 * 4 * t * c)  # double-buffered q and out blocks (f32)

    feasible = [t for t in (512, 256, 128, 64, 32, 16, 8) if est(t) <= budget] or [8]
    tq = min(feasible, key=lambda t: (-(-nq // t) * t, -t))
    return tq, -(-nq // tq) * tq


# --------------------------------------------------------------------------
# One-time (parameter-load-time) weight preparation — kept out of the traced forward
# --------------------------------------------------------------------------
def prepare_params(params, num_heads, mxu_dtype=jnp.bfloat16):
    C = params["wq"].shape[0]
    assert C % num_heads == 0
    scale = (C // num_heads) ** (-0.5)
    return {
        "wq_t": jnp.asarray(params["wq"] * scale).T.astype(mxu_dtype),   # (C, C), scale folded
        "wk_t": jnp.asarray(params["wk"]).T.astype(mxu_dtype),           # (C, C)
        "wv_t": jnp.asarray(params["wv"]).T.astype(mxu_dtype),           # (C, C)
        "wp_t": jnp.asarray(params["wproj"]).T.astype(mxu_dtype),        # (C, C)
        "b_p": jnp.asarray(params["bproj"], jnp.float32).reshape(1, C),  # (1, C) f32
    }


# --------------------------------------------------------------------------
# Full forward (mirrors MultiHeadAttention.forward); inputs are (N, B, C)
# --------------------------------------------------------------------------
def multi_head_attention(q_sbc, k_sbc, v_sbc, prepared, num_heads, attn_mask=None):
    q = jnp.transpose(q_sbc, (1, 0, 2))             # (B, Nq, C)
    k = jnp.transpose(k_sbc, (1, 0, 2))             # (B, Nk, C)
    v = jnp.transpose(v_sbc, (1, 0, 2))
    B, Nq, C = q.shape
    Nk = k.shape[1]
    H = num_heads
    Dh = C // H

    tq, nq_pad = _choose_q_tile(Nq, Nk, C)
    if nq_pad != Nq:                                # pad tail query rows; sliced off below
        q = jnp.pad(q, ((0, 0), (0, nq_pad - Nq), (0, 0)))

    has_bias = attn_mask is not None
    if has_bias:
        bias = jnp.where(attn_mask.astype(bool), -jnp.inf, 0.0).astype(jnp.float32)
        bias = bias[:, None, :]                     # (B, 1, Nk): 0 / -inf key-padding bias

    kernel = functools.partial(mha_kernel, num_heads=H, head_dim=Dh, has_bias=has_bias)

    def run(single_buffer_weights):
        def const_spec(shape):
            kw = {}
            if single_buffer_weights:
                # Constant-index operands: a second pipeline buffer is pure VMEM waste.
                kw["pipeline_mode"] = pl.Buffered(1)
            return pl.BlockSpec(shape, lambda b, qi: (0,) * len(shape), **kw)

        inputs = [q, k, v]
        in_specs = [
            pl.BlockSpec((1, tq, C), lambda b, qi: (b, qi, 0)),
            pl.BlockSpec((1, Nk, C), lambda b, qi: (b, 0, 0)),   # constant per batch
            pl.BlockSpec((1, Nk, C), lambda b, qi: (b, 0, 0)),
        ]
        if has_bias:
            inputs.append(bias)
            in_specs.append(pl.BlockSpec((1, 1, Nk), lambda b, qi: (b, 0, 0)))
        inputs += [prepared["wq_t"], prepared["wk_t"], prepared["wv_t"],
                   prepared["wp_t"], prepared["b_p"]]
        in_specs += [const_spec((C, C)) for _ in range(4)] + [const_spec((1, C))]

        return pl.pallas_call(
            kernel,
            out_shape=jax.ShapeDtypeStruct((B, nq_pad, C), q.dtype),
            grid=(B, nq_pad // tq),
            in_specs=in_specs,
            out_specs=pl.BlockSpec((1, tq, C), lambda b, qi: (b, qi, 0)),
            scratch_shapes=[pltpu.VMEM((Nk, C), jnp.bfloat16),   # kp carried across qi
                            pltpu.VMEM((Nk, C), jnp.bfloat16)],  # vp carried across qi
            compiler_params=pltpu.CompilerParams(
                # Batch axis parallel (2 TCs on v7x); the qi axis carries the kp/vp
                # scratch and therefore must stay 'arbitrary' (and last).
                dimension_semantics=("parallel", "arbitrary"),
                vmem_limit_bytes=48 * 1024 * 1024,
            ),
        )(*inputs)

    try:
        out = run(single_buffer_weights=True)
    except Exception:
        # TODO(synk): drop fallback once pl.Buffered(1) single-buffering of constant
        #             operands is available on all deployed jax versions.
        out = run(single_buffer_weights=False)

    if nq_pad != Nq:
        out = out[:, :Nq]
    return jnp.transpose(out, (1, 0, 2))            # back to (Nq, B, C)


# --------------------------------------------------------------------------
# Pure-JAX f32 reference (matches the PyTorch module semantics)
# --------------------------------------------------------------------------
def reference(q_sbc, k_sbc, v_sbc, params, num_heads, attn_mask=None):
    q = jnp.transpose(q_sbc, (1, 0, 2))
    k = jnp.transpose(k_sbc, (1, 0, 2))
    v = jnp.transpose(v_sbc, (1, 0, 2))
    B, Nq, C = q.shape
    Nk = k.shape[1]
    H = num_heads
    Dh = C // H
    scale = Dh ** (-0.5)

    qp = (q @ params["wq"].T).reshape(B, Nq, H, Dh).transpose(0, 2, 1, 3)
    kp = (k @ params["wk"].T).reshape(B, Nk, H, Dh).transpose(0, 2, 1, 3)
    vp = (v @ params["wv"].T).reshape(B, Nk, H, Dh).transpose(0, 2, 1, 3)

    if attn_mask is not None:
        bias = jnp.where(attn_mask.astype(bool), -jnp.inf, 0.0)[:, None, None, :]
    else:
        bias = jnp.zeros((B, 1, 1, Nk), q.dtype)

    attn = (qp @ kp.transpose(0, 1, 3, 2) + bias) * scale
    attn = jax.nn.softmax(attn, axis=-1)
    x = (attn @ vp).transpose(0, 2, 1, 3).reshape(B, Nq, C)
    x = x @ params["wproj"].T + params["bproj"]
    return x.transpose(1, 0, 2)


# --------------------------------------------------------------------------
if __name__ == "__main__":
    key = jax.random.PRNGKey(0)
    dim, num_heads = 32, 4
    B, Nq, Nk = 2, 8, 8

    keys = jax.random.split(key, 9)
    params = {
        "wq": 0.05 * jax.random.normal(keys[0], (dim, dim), jnp.float32),
        "wk": 0.05 * jax.random.normal(keys[1], (dim, dim), jnp.float32),
        "wv": 0.05 * jax.random.normal(keys[2], (dim, dim), jnp.float32),
        "wproj": 0.05 * jax.random.normal(keys[3], (dim, dim), jnp.float32),
        "bproj": 0.01 * jax.random.normal(keys[4], (dim,), jnp.float32),
    }
    prepared = prepare_params(params, num_heads)    # one-time, outside the hot forward

    q_in = jax.random.normal(keys[5], (Nq, B, dim), jnp.float32)
    k_in = jax.random.normal(keys[6], (Nk, B, dim), jnp.float32)
    v_in = jax.random.normal(keys[7], (Nk, B, dim), jnp.float32)

    # MXU operands run in bf16 (per the per-generation guidance); accumulation and the
    # softmax stay f32, so errors vs. the f32 reference sit at the bf16 rounding level.
    ATOL = RTOL = 2e-2

    # 1) no mask
    out = multi_head_attention(q_in, k_in, v_in, prepared, num_heads, attn_mask=None)
    jax.block_until_ready(out)
    ref = reference(q_in, k_in, v_in, params, num_heads, attn_mask=None)
    assert out.shape == (Nq, B, dim)
    assert jnp.allclose(out, ref, atol=ATOL, rtol=RTOL), "mismatch (no mask)"

    # 2) key-padding mask (True = masked out): last key masked for batch 1
    mask = jnp.zeros((B, Nk), jnp.int32).at[1, Nk - 1].set(1)
    out_m = multi_head_attention(q_in, k_in, v_in, prepared, num_heads, attn_mask=mask)
    jax.block_until_ready(out_m)
    ref_m = reference(q_in, k_in, v_in, params, num_heads, attn_mask=mask)
    assert jnp.allclose(out_m, ref_m, atol=ATOL, rtol=RTOL), "mismatch (mask)"

    # 3) non-divisible Nq: exercises query padding and the K/V-projection carry
    #    across multiple query tiles of the same batch.
    Nq2 = 20
    q2_in = jax.random.normal(keys[8], (Nq2, B, dim), jnp.float32)
    out_p = multi_head_attention(q2_in, k_in, v_in, prepared, num_heads, attn_mask=mask)
    jax.block_until_ready(out_p)
    ref_p = reference(q2_in, k_in, v_in, params, num_heads, attn_mask=mask)
    assert out_p.shape == (Nq2, B, dim)
    assert jnp.allclose(out_p, ref_p, atol=ATOL, rtol=RTOL), "mismatch (padded Nq)"

    print("KERNEL_OK")
</pallas_src>

<mosaic_0001>
module attributes {stable_mosaic.version = 11 : i64} {
  func.func @mha_kernel(%arg0: i32, %arg1: i32, %arg2: memref<1x8x32xf32, #tpu.memory_space<vmem>>, %arg3: memref<1x8x32xf32, #tpu.memory_space<vmem>>, %arg4: memref<1x8x32xf32, #tpu.memory_space<vmem>>, %arg5: memref<32x32xbf16, #tpu.memory_space<vmem>>, %arg6: memref<32x32xbf16, #tpu.memory_space<vmem>>, %arg7: memref<32x32xbf16, #tpu.memory_space<vmem>>, %arg8: memref<32x32xbf16, #tpu.memory_space<vmem>>, %arg9: memref<1x32xf32, #tpu.memory_space<vmem>>, %arg10: memref<1x8x32xf32, #tpu.memory_space<vmem>>, %arg11: memref<8x32xbf16, #tpu.memory_space<vmem>>, %arg12: memref<8x32xbf16, #tpu.memory_space<vmem>>) attributes {dimension_semantics = [#tpu.dimension_semantics<parallel>, #tpu.dimension_semantics<arbitrary>], iteration_bounds = array<i64: 2, 1>, scalar_prefetch = 0 : i64, scratch_operands = 2 : i64, tpu.core_type = #tpu.core_type<tc>, window_params = [{transform_indices = @transform_0, window_bounds = array<i64: 1, 8, 32>}, {transform_indices = @transform_1, window_bounds = array<i64: 1, 8, 32>}, {transform_indices = @transform_2, window_bounds = array<i64: 1, 8, 32>}, {pipeline_mode = #tpu.pipeline_mode<synchronous>, transform_indices = @transform_3, window_bounds = array<i64: 32, 32>}, {pipeline_mode = #tpu.pipeline_mode<synchronous>, transform_indices = @transform_4, window_bounds = array<i64: 32, 32>}, {pipeline_mode = #tpu.pipeline_mode<synchronous>, transform_indices = @transform_5, window_bounds = array<i64: 32, 32>}, {pipeline_mode = #tpu.pipeline_mode<synchronous>, transform_indices = @transform_6, window_bounds = array<i64: 32, 32>}, {pipeline_mode = #tpu.pipeline_mode<synchronous>, transform_indices = @transform_7, window_bounds = array<i64: 1, 32>}, {transform_indices = @transform_8, window_bounds = array<i64: 1, 8, 32>}]} {
    %c0_i32 = arith.constant 0 : i32
    %0 = arith.cmpi eq, %arg1, %c0_i32 : i32
    %1 = arith.extui %0 : i1 to i32
    %c0_i32_0 = arith.constant 0 : i32
    %2 = arith.cmpi ne, %1, %c0_i32_0 : i32
    scf.if %2 {
      %c0_33 = arith.constant 0 : index
      %c0_34 = arith.constant 0 : index
      %c0_35 = arith.constant 0 : index
      %85 = vector.load %arg3[%c0_33, %c0_34, %c0_35] : memref<1x8x32xf32, #tpu.memory_space<vmem>>, vector<1x8x32xf32>
      %86 = vector.shape_cast %85 : vector<1x8x32xf32> to vector<8x32xf32>
      %87 = arith.truncf %86 : vector<8x32xf32> to vector<8x32xbf16>
      %c0_36 = arith.constant 0 : index
      %c0_37 = arith.constant 0 : index
      %c0_38 = arith.constant 0 : index
      %88 = vector.load %arg4[%c0_36, %c0_37, %c0_38] : memref<1x8x32xf32, #tpu.memory_space<vmem>>, vector<1x8x32xf32>
      %89 = vector.shape_cast %88 : vector<1x8x32xf32> to vector<8x32xf32>
      %90 = arith.truncf %89 : vector<8x32xf32> to vector<8x32xbf16>
      %c0_39 = arith.constant 0 : index
      %c0_40 = arith.constant 0 : index
      %91 = vector.load %arg6[%c0_39, %c0_40] : memref<32x32xbf16, #tpu.memory_space<vmem>>, vector<32x32xbf16>
      %cst_41 = arith.constant dense<0.000000e+00> : vector<8x32xf32>
      %92 = tpu.matmul %87, %91, %cst_41 {dimension_numbers = #tpu.dot_dimension_numbers<[1], [0], [0], [1], [0, 0, 1, 1], [], []>} : vector<8x32xbf16>, vector<32x32xbf16>, vector<8x32xf32> -> vector<8x32xf32>
      %93 = arith.truncf %92 : vector<8x32xf32> to vector<8x32xbf16>
      %c0_42 = arith.constant 0 : index
      %c0_43 = arith.constant 0 : index
      %94 = vector.load %arg11[%c0_42, %c0_43] : memref<8x32xbf16, #tpu.memory_space<vmem>>, vector<8x32xbf16>
      tpu.vector_store %arg11[%c0_42, %c0_43], %93 {strides = array<i32>} : memref<8x32xbf16, #tpu.memory_space<vmem>>, vector<8x32xbf16>,
      %c0_44 = arith.constant 0 : index
      %c0_45 = arith.constant 0 : index
      %95 = vector.load %arg7[%c0_44, %c0_45] : memref<32x32xbf16, #tpu.memory_space<vmem>>, vector<32x32xbf16>
      %cst_46 = arith.constant dense<0.000000e+00> : vector<8x32xf32>
      %96 = tpu.matmul %90, %95, %cst_46 {dimension_numbers = #tpu.dot_dimension_numbers<[1], [0], [0], [1], [0, 0, 1, 1], [], []>} : vector<8x32xbf16>, vector<32x32xbf16>, vector<8x32xf32> -> vector<8x32xf32>
      %97 = arith.truncf %96 : vector<8x32xf32> to vector<8x32xbf16>
      %c0_47 = arith.constant 0 : index
      %c0_48 = arith.constant 0 : index
      %98 = vector.load %arg12[%c0_47, %c0_48] : memref<8x32xbf16, #tpu.memory_space<vmem>>, vector<8x32xbf16>
      tpu.vector_store %arg12[%c0_47, %c0_48], %97 {strides = array<i32>} : memref<8x32xbf16, #tpu.memory_space<vmem>>, vector<8x32xbf16>,
    } else {
    }
    %c0 = arith.constant 0 : index
    %c0_1 = arith.constant 0 : index
    %c0_2 = arith.constant 0 : index
    %3 = vector.load %arg2[%c0, %c0_1, %c0_2] : memref<1x8x32xf32, #tpu.memory_space<vmem>>, vector<1x8x32xf32>
    %4 = vector.shape_cast %3 : vector<1x8x32xf32> to vector<8x32xf32>
    %5 = arith.truncf %4 : vector<8x32xf32> to vector<8x32xbf16>
    %c0_3 = arith.constant 0 : index
    %c0_4 = arith.constant 0 : index
    %6 = vector.load %arg5[%c0_3, %c0_4] : memref<32x32xbf16, #tpu.memory_space<vmem>>, vector<32x32xbf16>
    %cst = arith.constant dense<0.000000e+00> : vector<8x32xf32>
    %7 = tpu.matmul %5, %6, %cst {dimension_numbers = #tpu.dot_dimension_numbers<[1], [0], [0], [1], [0, 0, 1, 1], [], []>} : vector<8x32xbf16>, vector<32x32xbf16>, vector<8x32xf32> -> vector<8x32xf32>
    %8 = arith.truncf %7 : vector<8x32xf32> to vector<8x32xbf16>
    %c0_5 = arith.constant 0 : index
    %c0_6 = arith.constant 0 : index
    %9 = vector.load %arg11[%c0_5, %c0_6] : memref<8x32xbf16, #tpu.memory_space<vmem>>, vector<8x32xbf16>
    %c0_7 = arith.constant 0 : index
    %c0_8 = arith.constant 0 : index
    %10 = vector.load %arg12[%c0_7, %c0_8] : memref<8x32xbf16, #tpu.memory_space<vmem>>, vector<8x32xbf16>
    %11 = vector.extract_strided_slice %8 {offsets = [0, 0], sizes = [8, 8], strides = [1, 1]} : vector<8x32xbf16> to vector<8x8xbf16>
    %12 = vector.extract_strided_slice %9 {offsets = [0, 0], sizes = [8, 8], strides = [1, 1]} : vector<8x32xbf16> to vector<8x8xbf16>
    %cst_9 = arith.constant dense<0.000000e+00> : vector<8x8xf32>
    %13 = tpu.matmul %11, %12, %cst_9 {dimension_numbers = #tpu.dot_dimension_numbers<[1], [1], [0], [0], [0, 0, 1, 0], [], []>} : vector<8x8xbf16>, vector<8x8xbf16>, vector<8x8xf32> -> vector<8x8xf32>
    %cst_10 = arith.constant dense<0xFF800000> : vector<8xf32>
    %14 = vector.multi_reduction <maximumf>, %13, %cst_10 [1] : vector<8x8xf32> to vector<8xf32>
    %15 = vector.shape_cast %14 : vector<8xf32> to vector<8x1xf32>
    %16 = vector.broadcast %15 : vector<8x1xf32> to vector<8x8xf32>
    %17 = arith.subf %13, %16 : vector<8x8xf32>
    %18 = math.exp %17 : vector<8x8xf32>
    %cst_11 = arith.constant dense<0.000000e+00> : vector<8xf32>
    %19 = vector.multi_reduction <add>, %18, %cst_11 [1] : vector<8x8xf32> to vector<8xf32>
    %20 = vector.shape_cast %19 : vector<8xf32> to vector<8x1xf32>
    %21 = arith.truncf %18 : vector<8x8xf32> to vector<8x8xbf16>
    %22 = vector.extract_strided_slice %10 {offsets = [0, 0], sizes = [8, 8], strides = [1, 1]} : vector<8x32xbf16> to vector<8x8xbf16>
    %cst_12 = arith.constant dense<0.000000e+00> : vector<8x8xf32>
    %23 = tpu.matmul %21, %22, %cst_12 {dimension_numbers = #tpu.dot_dimension_numbers<[1], [0], [0], [1], [0, 0, 1, 1], [], []>} : vector<8x8xbf16>, vector<8x8xbf16>, vector<8x8xf32> -> vector<8x8xf32>
    %24 = tpu.reciprocal %20 {approx = true} : vector<8x1xf32> -> vector<8x1xf32>
    %25 = vector.broadcast %24 : vector<8x1xf32> to vector<8x8xf32>
    %26 = arith.mulf %23, %25 : vector<8x8xf32>
    %27 = vector.extract_strided_slice %8 {offsets = [0, 8], sizes = [8, 8], strides = [1, 1]} : vector<8x32xbf16> to vector<8x8xbf16>
    %28 = vector.extract_strided_slice %9 {offsets = [0, 8], sizes = [8, 8], strides = [1, 1]} : vector<8x32xbf16> to vector<8x8xbf16>
    %cst_13 = arith.constant dense<0.000000e+00> : vector<8x8xf32>
    %29 = tpu.matmul %27, %28, %cst_13 {dimension_numbers = #tpu.dot_dimension_numbers<[1], [1], [0], [0], [0, 0, 1, 0], [], []>} : vector<8x8xbf16>, vector<8x8xbf16>, vector<8x8xf32> -> vector<8x8xf32>
    %cst_14 = arith.constant dense<0xFF800000> : vector<8xf32>
    %30 = vector.multi_reduction <maximumf>, %29, %cst_14 [1] : vector<8x8xf32> to vector<8xf32>
    %31 = vector.shape_cast %30 : vector<8xf32> to vector<8x1xf32>
    %32 = vector.broadcast %31 : vector<8x1xf32> to vector<8x8xf32>
    %33 = arith.subf %29, %32 : vector<8x8xf32>
    %34 = math.exp %33 : vector<8x8xf32>
    %cst_15 = arith.constant dense<0.000000e+00> : vector<8xf32>
    %35 = vector.multi_reduction <add>, %34, %cst_15 [1] : vector<8x8xf32> to vector<8xf32>
    %36 = vector.shape_cast %35 : vector<8xf32> to vector<8x1xf32>
    %37 = arith.truncf %34 : vector<8x8xf32> to vector<8x8xbf16>
    %38 = vector.extract_strided_slice %10 {offsets = [0, 8], sizes = [8, 8], strides = [1, 1]} : vector<8x32xbf16> to vector<8x8xbf16>
    %cst_16 = arith.constant dense<0.000000e+00> : vector<8x8xf32>
    %39 = tpu.matmul %37, %38, %cst_16 {dimension_numbers = #tpu.dot_dimension_numbers<[1], [0], [0], [1], [0, 0, 1, 1], [], []>} : vector<8x8xbf16>, vector<8x8xbf16>, vector<8x8xf32> -> vector<8x8xf32>
    %40 = tpu.reciprocal %36 {approx = true} : vector<8x1xf32> -> vector<8x1xf32>
    %41 = vector.broadcast %40 : vector<8x1xf32> to vector<8x8xf32>
    %42 = arith.mulf %39, %41 : vector<8x8xf32>
    %43 = vector.extract_strided_slice %8 {offsets = [0, 16], sizes = [8, 8], strides = [1, 1]} : vector<8x32xbf16> to vector<8x8xbf16>
    %44 = vector.extract_strided_slice %9 {offsets = [0, 16], sizes = [8, 8], strides = [1, 1]} : vector<8x32xbf16> to vector<8x8xbf16>
    %cst_17 = arith.constant dense<0.000000e+00> : vector<8x8xf32>
    %45 = tpu.matmul %43, %44, %cst_17 {dimension_numbers = #tpu.dot_dimension_numbers<[1], [1], [0], [0], [0, 0, 1, 0], [], []>} : vector<8x8xbf16>, vector<8x8xbf16>, vector<8x8xf32> -> vector<8x8xf32>
    %cst_18 = arith.constant dense<0xFF800000> : vector<8xf32>
    %46 = vector.multi_reduction <maximumf>, %45, %cst_18 [1] : vector<8x8xf32> to vector<8xf32>
    %47 = vector.shape_cast %46 : vector<8xf32> to vector<8x1xf32>
    %48 = vector.broadcast %47 : vector<8x1xf32> to vector<8x8xf32>
    %49 = arith.subf %45, %48 : vector<8x8xf32>
    %50 = math.exp %49 : vector<8x8xf32>
    %cst_19 = arith.constant dense<0.000000e+00> : vector<8xf32>
    %51 = vector.multi_reduction <add>, %50, %cst_19 [1] : vector<8x8xf32> to vector<8xf32>
    %52 = vector.shape_cast %51 : vector<8xf32> to vector<8x1xf32>
    %53 = arith.truncf %50 : vector<8x8xf32> to vector<8x8xbf16>
    %54 = vector.extract_strided_slice %10 {offsets = [0, 16], sizes = [8, 8], strides = [1, 1]} : vector<8x32xbf16> to vector<8x8xbf16>
    %cst_20 = arith.constant dense<0.000000e+00> : vector<8x8xf32>
    %55 = tpu.matmul %53, %54, %cst_20 {dimension_numbers = #tpu.dot_dimension_numbers<[1], [0], [0], [1], [0, 0, 1, 1], [], []>} : vector<8x8xbf16>, vector<8x8xbf16>, vector<8x8xf32> -> vector<8x8xf32>
    %56 = tpu.reciprocal %52 {approx = true} : vector<8x1xf32> -> vector<8x1xf32>
    %57 = vector.broadcast %56 : vector<8x1xf32> to vector<8x8xf32>
    %58 = arith.mulf %55, %57 : vector<8x8xf32>
    %59 = vector.extract_strided_slice %8 {offsets = [0, 24], sizes = [8, 8], strides = [1, 1]} : vector<8x32xbf16> to vector<8x8xbf16>
    %60 = vector.extract_strided_slice %9 {offsets = [0, 24], sizes = [8, 8], strides = [1, 1]} : vector<8x32xbf16> to vector<8x8xbf16>
    %cst_21 = arith.constant dense<0.000000e+00> : vector<8x8xf32>
    %61 = tpu.matmul %59, %60, %cst_21 {dimension_numbers = #tpu.dot_dimension_numbers<[1], [1], [0], [0], [0, 0, 1, 0], [], []>} : vector<8x8xbf16>, vector<8x8xbf16>, vector<8x8xf32> -> vector<8x8xf32>
    %cst_22 = arith.constant dense<0xFF800000> : vector<8xf32>
    %62 = vector.multi_reduction <maximumf>, %61, %cst_22 [1] : vector<8x8xf32> to vector<8xf32>
    %63 = vector.shape_cast %62 : vector<8xf32> to vector<8x1xf32>
    %64 = vector.broadcast %63 : vector<8x1xf32> to vector<8x8xf32>
    %65 = arith.subf %61, %64 : vector<8x8xf32>
    %66 = math.exp %65 : vector<8x8xf32>
    %cst_23 = arith.constant dense<0.000000e+00> : vector<8xf32>
    %67 = vector.multi_reduction <add>, %66, %cst_23 [1] : vector<8x8xf32> to vector<8xf32>
    %68 = vector.shape_cast %67 : vector<8xf32> to vector<8x1xf32>
    %69 = arith.truncf %66 : vector<8x8xf32> to vector<8x8xbf16>
    %70 = vector.extract_strided_slice %10 {offsets = [0, 24], sizes = [8, 8], strides = [1, 1]} : vector<8x32xbf16> to vector<8x8xbf16>
    %cst_24 = arith.constant dense<0.000000e+00> : vector<8x8xf32>
    %71 = tpu.matmul %69, %70, %cst_24 {dimension_numbers = #tpu.dot_dimension_numbers<[1], [0], [0], [1], [0, 0, 1, 1], [], []>} : vector<8x8xbf16>, vector<8x8xbf16>, vector<8x8xf32> -> vector<8x8xf32>
    %72 = tpu.reciprocal %68 {approx = true} : vector<8x1xf32> -> vector<8x1xf32>
    %73 = vector.broadcast %72 : vector<8x1xf32> to vector<8x8xf32>
    %74 = arith.mulf %71, %73 : vector<8x8xf32>
    %75 = tpu.concatenate %26, %42, %58, %74 in 1 : vector<8x8xf32>, vector<8x8xf32>, vector<8x8xf32>, vector<8x8xf32> -> vector<8x32xf32>
    %76 = arith.truncf %75 : vector<8x32xf32> to vector<8x32xbf16>
    %c0_25 = arith.constant 0 : index
    %c0_26 = arith.constant 0 : index
    %77 = vector.load %arg8[%c0_25, %c0_26] : memref<32x32xbf16, #tpu.memory_space<vmem>>, vector<32x32xbf16>
    %cst_27 = arith.constant dense<0.000000e+00> : vector<8x32xf32>
    %78 = tpu.matmul %76, %77, %cst_27 {dimension_numbers = #tpu.dot_dimension_numbers<[1], [0], [0], [1], [0, 0, 1, 1], [], []>} : vector<8x32xbf16>, vector<32x32xbf16>, vector<8x32xf32> -> vector<8x32xf32>
    %c0_28 = arith.constant 0 : index
    %c0_29 = arith.constant 0 : index
    %79 = vector.load %arg9[%c0_28, %c0_29] : memref<1x32xf32, #tpu.memory_space<vmem>>, vector<1x32xf32>
    %80 = vector.broadcast %79 : vector<1x32xf32> to vector<8x32xf32>
    %81 = arith.addf %78, %80 : vector<8x32xf32>
    %c0_30 = arith.constant 0 : index
    %c0_31 = arith.constant 0 : index
    %c0_32 = arith.constant 0 : index
    %82 = vector.load %arg10[%c0_30, %c0_31, %c0_32] : memref<1x8x32xf32, #tpu.memory_space<vmem>>, vector<1x8x32xf32>
    %83 = vector.shape_cast %82 : vector<1x8x32xf32> to vector<8x32xf32>
    %84 = vector.shape_cast %81 : vector<8x32xf32> to vector<1x8x32xf32>
    tpu.vector_store %arg10[%c0_30, %c0_31, %c0_32], %84 {strides = array<i32>} : memref<1x8x32xf32, #tpu.memory_space<vmem>>, vector<1x8x32xf32>,
    return
  }
  func.func @transform_0(%arg0: i32, %arg1: i32) -> (i32, i32, i32) {
    %c0_i32 = arith.constant 0 : i32
    %c0_i32_0 = arith.constant 0 : i32
    return %arg0, %arg1, %c0_i32 : i32, i32, i32
  }
  func.func @transform_1(%arg0: i32, %arg1: i32) -> (i32, i32, i32) {
    %c0_i32 = arith.constant 0 : i32
    %c0_i32_0 = arith.constant 0 : i32
    %c0_i32_1 = arith.constant 0 : i32
    return %arg0, %c0_i32, %c0_i32_0 : i32, i32, i32
  }
  func.func @transform_2(%arg0: i32, %arg1: i32) -> (i32, i32, i32) {
    %c0_i32 = arith.constant 0 : i32
    %c0_i32_0 = arith.constant 0 : i32
    %c0_i32_1 = arith.constant 0 : i32
    return %arg0, %c0_i32, %c0_i32_0 : i32, i32, i32
  }
  func.func @transform_3(%arg0: i32, %arg1: i32) -> (i32, i32) {
    %c0_i32 = arith.constant 0 : i32
    %c0_i32_0 = arith.constant 0 : i32
    %c0_i32_1 = arith.constant 0 : i32
    return %c0_i32, %c0_i32_0 : i32, i32
  }
  func.func @transform_4(%arg0: i32, %arg1: i32) -> (i32, i32) {
    %c0_i32 = arith.constant 0 : i32
    %c0_i32_0 = arith.constant 0 : i32
    %c0_i32_1 = arith.constant 0 : i32
    return %c0_i32, %c0_i32_0 : i32, i32
  }
  func.func @transform_5(%arg0: i32, %arg1: i32) -> (i32, i32) {
    %c0_i32 = arith.constant 0 : i32
    %c0_i32_0 = arith.constant 0 : i32
    %c0_i32_1 = arith.constant 0 : i32
    return %c0_i32, %c0_i32_0 : i32, i32
  }
  func.func @transform_6(%arg0: i32, %arg1: i32) -> (i32, i32) {
    %c0_i32 = arith.constant 0 : i32
    %c0_i32_0 = arith.constant 0 : i32
    %c0_i32_1 = arith.constant 0 : i32
    return %c0_i32, %c0_i32_0 : i32, i32
  }
  func.func @transform_7(%arg0: i32, %arg1: i32) -> (i32, i32) {
    %c0_i32 = arith.constant 0 : i32
    %c0_i32_0 = arith.constant 0 : i32
    %c0_i32_1 = arith.constant 0 : i32
    return %c0_i32, %c0_i32_0 : i32, i32
  }
  func.func @transform_8(%arg0: i32, %arg1: i32) -> (i32, i32, i32) {
    %c0_i32 = arith.constant 0 : i32
    %c0_i32_0 = arith.constant 0 : i32
    return %arg0, %arg1, %c0_i32 : i32, i32, i32
  }
}

module attributes {stable_mosaic.version = 11 : i64} {
  func.func @mha_kernel(%arg0: i32, %arg1: i32, %arg2: memref<1x8x32xf32, #tpu.memory_space<vmem>>, %arg3: memref<1x8x32xf32, #tpu.memory_space<vmem>>, %arg4: memref<1x8x32xf32, #tpu.memory_space<vmem>>, %arg5: memref<32x32xbf16, #tpu.memory_space<vmem>>, %arg6: memref<32x32xbf16, #tpu.memory_space<vmem>>, %arg7: memref<32x32xbf16, #tpu.memory_space<vmem>>, %arg8: memref<32x32xbf16, #tpu.memory_space<vmem>>, %arg9: memref<1x32xf32, #tpu.memory_space<vmem>>, %arg10: memref<1x8x32xf32, #tpu.memory_space<vmem>>, %arg11: memref<8x32xbf16, #tpu.memory_space<vmem>>, %arg12: memref<8x32xbf16, #tpu.memory_space<vmem>>) attributes {dimension_semantics = [#tpu.dimension_semantics<parallel>, #tpu.dimension_semantics<arbitrary>], iteration_bounds = array<i64: 2, 1>, scalar_prefetch = 0 : i64, scratch_operands = 2 : i64, tpu.core_type = #tpu.core_type<tc>, window_params = [{transform_indices = @transform_0, window_bounds = array<i64: 1, 8, 32>}, {transform_indices = @transform_1, window_bounds = array<i64: 1, 8, 32>}, {transform_indices = @transform_2, window_bounds = array<i64: 1, 8, 32>}, {pipeline_mode = #tpu.pipeline_mode<synchronous>, transform_indices = @transform_3, window_bounds = array<i64: 32, 32>}, {pipeline_mode = #tpu.pipeline_mode<synchronous>, transform_indices = @transform_4, window_bounds = array<i64: 32, 32>}, {pipeline_mode = #tpu.pipeline_mode<synchronous>, transform_indices = @transform_5, window_bounds = array<i64: 32, 32>}, {pipeline_mode = #tpu.pipeline_mode<synchronous>, transform_indices = @transform_6, window_bounds = array<i64: 32, 32>}, {pipeline_mode = #tpu.pipeline_mode<synchronous>, transform_indices = @transform_7, window_bounds = array<i64: 1, 32>}, {transform_indices = @transform_8, window_bounds = array<i64: 1, 8, 32>}]} {
    %c0_i32 = arith.constant 0 : i32
    %0 = arith.cmpi eq, %arg1, %c0_i32 : i32
    %1 = arith.extui %0 : i1 to i32
    %c0_i32_0 = arith.constant 0 : i32
    %2 = arith.cmpi ne, %1, %c0_i32_0 : i32
    scf.if %2 {
      %c0_33 = arith.constant 0 : index
      %c0_34 = arith.constant 0 : index
      %c0_35 = arith.constant 0 : index
      %85 = vector.load %arg3[%c0_33, %c0_34, %c0_35] : memref<1x8x32xf32, #tpu.memory_space<vmem>>, vector<1x8x32xf32>
      %86 = vector.shape_cast %85 : vector<1x8x32xf32> to vector<8x32xf32>
      %87 = arith.truncf %86 : vector<8x32xf32> to vector<8x32xbf16>
      %c0_36 = arith.constant 0 : index
      %c0_37 = arith.constant 0 : index
      %c0_38 = arith.constant 0 : index
      %88 = vector.load %arg4[%c0_36, %c0_37, %c0_38] : memref<1x8x32xf32, #tpu.memory_space<vmem>>, vector<1x8x32xf32>
      %89 = vector.shape_cast %88 : vector<1x8x32xf32> to vector<8x32xf32>
      %90 = arith.truncf %89 : vector<8x32xf32> to vector<8x32xbf16>
      %c0_39 = arith.constant 0 : index
      %c0_40 = arith.constant 0 : index
      %91 = vector.load %arg6[%c0_39, %c0_40] : memref<32x32xbf16, #tpu.memory_space<vmem>>, vector<32x32xbf16>
      %cst_41 = arith.constant dense<0.000000e+00> : vector<8x32xf32>
      %92 = tpu.matmul %87, %91, %cst_41 {dimension_numbers = #tpu.dot_dimension_numbers<[1], [0], [0], [1], [0, 0, 1, 1], [], []>} : vector<8x32xbf16>, vector<32x32xbf16>, vector<8x32xf32> -> vector<8x32xf32>
      %93 = arith.truncf %92 : vector<8x32xf32> to vector<8x32xbf16>
      %c0_42 = arith.constant 0 : index
      %c0_43 = arith.constant 0 : index
      %94 = vector.load %arg11[%c0_42, %c0_43] : memref<8x32xbf16, #tpu.memory_space<vmem>>, vector<8x32xbf16>
      tpu.vector_store %arg11[%c0_42, %c0_43], %93 {strides = array<i32>} : memref<8x32xbf16, #tpu.memory_space<vmem>>, vector<8x32xbf16>,
      %c0_44 = arith.constant 0 : index
      %c0_45 = arith.constant 0 : index
      %95 = vector.load %arg7[%c0_44, %c0_45] : memref<32x32xbf16, #tpu.memory_space<vmem>>, vector<32x32xbf16>
      %cst_46 = arith.constant dense<0.000000e+00> : vector<8x32xf32>
      %96 = tpu.matmul %90, %95, %cst_46 {dimension_numbers = #tpu.dot_dimension_numbers<[1], [0], [0], [1], [0, 0, 1, 1], [], []>} : vector<8x32xbf16>, vector<32x32xbf16>, vector<8x32xf32> -> vector<8x32xf32>
      %97 = arith.truncf %96 : vector<8x32xf32> to vector<8x32xbf16>
      %c0_47 = arith.constant 0 : index
      %c0_48 = arith.constant 0 : index
      %98 = vector.load %arg12[%c0_47, %c0_48] : memref<8x32xbf16, #tpu.memory_space<vmem>>, vector<8x32xbf16>
      tpu.vector_store %arg12[%c0_47, %c0_48], %97 {strides = array<i32>} : memref<8x32xbf16, #tpu.memory_space<vmem>>, vector<8x32xbf16>,
    } else {
    }
    %c0 = arith.constant 0 : index
    %c0_1 = arith.constant 0 : index
    %c0_2 = arith.constant 0 : index
    %3 = vector.load %arg2[%c0, %c0_1, %c0_2] : memref<1x8x32xf32, #tpu.memory_space<vmem>>, vector<1x8x32xf32>
    %4 = vector.shape_cast %3 : vector<1x8x32xf32> to vector<8x32xf32>
    %5 = arith.truncf %4 : vector<8x32xf32> to vector<8x32xbf16>
    %c0_3 = arith.constant 0 : index
    %c0_4 = arith.constant 0 : index
    %6 = vector.load %arg5[%c0_3, %c0_4] : memref<32x32xbf16, #tpu.memory_space<vmem>>, vector<32x32xbf16>
    %cst = arith.constant dense<0.000000e+00> : vector<8x32xf32>
    %7 = tpu.matmul %5, %6, %cst {dimension_numbers = #tpu.dot_dimension_numbers<[1], [0], [0], [1], [0, 0, 1, 1], [], []>} : vector<8x32xbf16>, vector<32x32xbf16>, vector<8x32xf32> -> vector<8x32xf32>
    %8 = arith.truncf %7 : vector<8x32xf32> to vector<8x32xbf16>
    %c0_5 = arith.constant 0 : index
    %c0_6 = arith.constant 0 : index
    %9 = vector.load %arg11[%c0_5, %c0_6] : memref<8x32xbf16, #tpu.memory_space<vmem>>, vector<8x32xbf16>
    %c0_7 = arith.constant 0 : index
    %c0_8 = arith.constant 0 : index
    %10 = vector.load %arg12[%c0_7, %c0_8] : memref<8x32xbf16, #tpu.memory_space<vmem>>, vector<8x32xbf16>
    %11 = vector.extract_strided_slice %8 {offsets = [0, 0], sizes = [8, 8], strides = [1, 1]} : vector<8x32xbf16> to vector<8x8xbf16>
    %12 = vector.extract_strided_slice %9 {offsets = [0, 0], sizes = [8, 8], strides = [1, 1]} : vector<8x32xbf16> to vector<8x8xbf16>
    %cst_9 = arith.constant dense<0.000000e+00> : vector<8x8xf32>
    %13 = tpu.matmul %11, %12, %cst_9 {dimension_numbers = #tpu.dot_dimension_numbers<[1], [1], [0], [0], [0, 0, 1, 0], [], []>} : vector<8x8xbf16>, vector<8x8xbf16>, vector<8x8xf32> -> vector<8x8xf32>
    %cst_10 = arith.constant dense<0xFF800000> : vector<8xf32>
    %14 = vector.multi_reduction <maximumf>, %13, %cst_10 [1] : vector<8x8xf32> to vector<8xf32>
    %15 = vector.shape_cast %14 : vector<8xf32> to vector<8x1xf32>
    %16 = vector.broadcast %15 : vector<8x1xf32> to vector<8x8xf32>
    %17 = arith.subf %13, %16 : vector<8x8xf32>
    %18 = math.exp %17 : vector<8x8xf32>
    %cst_11 = arith.constant dense<0.000000e+00> : vector<8xf32>
    %19 = vector.multi_reduction <add>, %18, %cst_11 [1] : vector<8x8xf32> to vector<8xf32>
    %20 = vector.shape_cast %19 : vector<8xf32> to vector<8x1xf32>
    %21 = arith.truncf %18 : vector<8x8xf32> to vector<8x8xbf16>
    %22 = vector.extract_strided_slice %10 {offsets = [0, 0], sizes = [8, 8], strides = [1, 1]} : vector<8x32xbf16> to vector<8x8xbf16>
    %cst_12 = arith.constant dense<0.000000e+00> : vector<8x8xf32>
    %23 = tpu.matmul %21, %22, %cst_12 {dimension_numbers = #tpu.dot_dimension_numbers<[1], [0], [0], [1], [0, 0, 1, 1], [], []>} : vector<8x8xbf16>, vector<8x8xbf16>, vector<8x8xf32> -> vector<8x8xf32>
    %24 = tpu.reciprocal %20 {approx = true} : vector<8x1xf32> -> vector<8x1xf32>
    %25 = vector.broadcast %24 : vector<8x1xf32> to vector<8x8xf32>
    %26 = arith.mulf %23, %25 : vector<8x8xf32>
    %27 = vector.extract_strided_slice %8 {offsets = [0, 8], sizes = [8, 8], strides = [1, 1]} : vector<8x32xbf16> to vector<8x8xbf16>
    %28 = vector.extract_strided_slice %9 {offsets = [0, 8], sizes = [8, 8], strides = [1, 1]} : vector<8x32xbf16> to vector<8x8xbf16>
    %cst_13 = arith.constant dense<0.000000e+00> : vector<8x8xf32>
    %29 = tpu.matmul %27, %28, %cst_13 {dimension_numbers = #tpu.dot_dimension_numbers<[1], [1], [0], [0], [0, 0, 1, 0], [], []>} : vector<8x8xbf16>, vector<8x8xbf16>, vector<8x8xf32> -> vector<8x8xf32>
    %cst_14 = arith.constant dense<0xFF800000> : vector<8xf32>
    %30 = vector.multi_reduction <maximumf>, %29, %cst_14 [1] : vector<8x8xf32> to vector<8xf32>
    %31 = vector.shape_cast %30 : vector<8xf32> to vector<8x1xf32>
    %32 = vector.broadcast %31 : vector<8x1xf32> to vector<8x8xf32>
    %33 = arith.subf %29, %32 : vector<8x8xf32>
    %34 = math.exp %33 : vector<8x8xf32>
    %cst_15 = arith.constant dense<0.000000e+00> : vector<8xf32>
    %35 = vector.multi_reduction <add>, %34, %cst_15 [1] : vector<8x8xf32> to vector<8xf32>
    %36 = vector.shape_cast %35 : vector<8xf32> to vector<8x1xf32>
    %37 = arith.truncf %34 : vector<8x8xf32> to vector<8x8xbf16>
    %38 = vector.extract_strided_slice %10 {offsets = [0, 8], sizes = [8, 8], strides = [1, 1]} : vector<8x32xbf16> to vector<8x8xbf16>
    %cst_16 = arith.constant dense<0.000000e+00> : vector<8x8xf32>
    %39 = tpu.matmul %37, %38, %cst_16 {dimension_numbers = #tpu.dot_dimension_numbers<[1], [0], [0], [1], [0, 0, 1, 1], [], []>} : vector<8x8xbf16>, vector<8x8xbf16>, vector<8x8xf32> -> vector<8x8xf32>
    %40 = tpu.reciprocal %36 {approx = true} : vector<8x1xf32> -> vector<8x1xf32>
    %41 = vector.broadcast %40 : vector<8x1xf32> to vector<8x8xf32>
    %42 = arith.mulf %39, %41 : vector<8x8xf32>
    %43 = vector.extract_strided_slice %8 {offsets = [0, 16], sizes = [8, 8], strides = [1, 1]} : vector<8x32xbf16> to vector<8x8xbf16>
    %44 = vector.extract_strided_slice %9 {offsets = [0, 16], sizes = [8, 8], strides = [1, 1]} : vector<8x32xbf16> to vector<8x8xbf16>
    %cst_17 = arith.constant dense<0.000000e+00> : vector<8x8xf32>
    %45 = tpu.matmul %43, %44, %cst_17 {dimension_numbers = #tpu.dot_dimension_numbers<[1], [1], [0], [0], [0, 0, 1, 0], [], []>} : vector<8x8xbf16>, vector<8x8xbf16>, vector<8x8xf32> -> vector<8x8xf32>
    %cst_18 = arith.constant dense<0xFF800000> : vector<8xf32>
    %46 = vector.multi_reduction <maximumf>, %45, %cst_18 [1] : vector<8x8xf32> to vector<8xf32>
    %47 = vector.shape_cast %46 : vector<8xf32> to vector<8x1xf32>
    %48 = vector.broadcast %47 : vector<8x1xf32> to vector<8x8xf32>
    %49 = arith.subf %45, %48 : vector<8x8xf32>
    %50 = math.exp %49 : vector<8x8xf32>
    %cst_19 = arith.constant dense<0.000000e+00> : vector<8xf32>
    %51 = vector.multi_reduction <add>, %50, %cst_19 [1] : vector<8x8xf32> to vector<8xf32>
    %52 = vector.shape_cast %51 : vector<8xf32> to vector<8x1xf32>
    %53 = arith.truncf %50 : vector<8x8xf32> to vector<8x8xbf16>
    %54 = vector.extract_strided_slice %10 {offsets = [0, 16], sizes = [8, 8], strides = [1, 1]} : vector<8x32xbf16> to vector<8x8xbf16>
    %cst_20 = arith.constant dense<0.000000e+00> : vector<8x8xf32>
    %55 = tpu.matmul %53, %54, %cst_20 {dimension_numbers = #tpu.dot_dimension_numbers<[1], [0], [0], [1], [0, 0, 1, 1], [], []>} : vector<8x8xbf16>, vector<8x8xbf16>, vector<8x8xf32> -> vector<8x8xf32>
    %56 = tpu.reciprocal %52 {approx = true} : vector<8x1xf32> -> vector<8x1xf32>
    %57 = vector.broadcast %56 : vector<8x1xf32> to vector<8x8xf32>
    %58 = arith.mulf %55, %57 : vector<8x8xf32>
    %59 = vector.extract_strided_slice %8 {offsets = [0, 24], sizes = [8, 8], strides = [1, 1]} : vector<8x32xbf16> to vector<8x8xbf16>
    %60 = vector.extract_strided_slice %9 {offsets = [0, 24], sizes = [8, 8], strides = [1, 1]} : vector<8x32xbf16> to vector<8x8xbf16>
    %cst_21 = arith.constant dense<0.000000e+00> : vector<8x8xf32>
    %61 = tpu.matmul %59, %60, %cst_21 {dimension_numbers = #tpu.dot_dimension_numbers<[1], [1], [0], [0], [0, 0, 1, 0], [], []>} : vector<8x8xbf16>, vector<8x8xbf16>, vector<8x8xf32> -> vector<8x8xf32>
    %cst_22 = arith.constant dense<0xFF800000> : vector<8xf32>
    %62 = vector.multi_reduction <maximumf>, %61, %cst_22 [1] : vector<8x8xf32> to vector<8xf32>
    %63 = vector.shape_cast %62 : vector<8xf32> to vector<8x1xf32>
    %64 = vector.broadcast %63 : vector<8x1xf32> to vector<8x8xf32>
    %65 = arith.subf %61, %64 : vector<8x8xf32>
    %66 = math.exp %65 : vector<8x8xf32>
    %cst_23 = arith.constant dense<0.000000e+00> : vector<8xf32>
    %67 = vector.multi_reduction <add>, %66, %cst_23 [1] : vector<8x8xf32> to vector<8xf32>
    %68 = vector.shape_cast %67 : vector<8xf32> to vector<8x1xf32>
    %69 = arith.truncf %66 : vector<8x8xf32> to vector<8x8xbf16>
    %70 = vector.extract_strided_slice %10 {offsets = [0, 24], sizes = [8, 8], strides = [1, 1]} : vector<8x32xbf16> to vector<8x8xbf16>
    %cst_24 = arith.constant dense<0.000000e+00> : vector<8x8xf32>
    %71 = tpu.matmul %69, %70, %cst_24 {dimension_numbers = #tpu.dot_dimension_numbers<[1], [0], [0], [1], [0, 0, 1, 1], [], []>} : vector<8x8xbf16>, vector<8x8xbf16>, vector<8x8xf32> -> vector<8x8xf32>
    %72 = tpu.reciprocal %68 {approx = true} : vector<8x1xf32> -> vector<8x1xf32>
    %73 = vector.broadcast %72 : vector<8x1xf32> to vector<8x8xf32>
    %74 = arith.mulf %71, %73 : vector<8x8xf32>
    %75 = tpu.concatenate %26, %42, %58, %74 in 1 : vector<8x8xf32>, vector<8x8xf32>, vector<8x8xf32>, vector<8x8xf32> -> vector<8x32xf32>
    %76 = arith.truncf %75 : vector<8x32xf32> to vector<8x32xbf16>
    %c0_25 = arith.constant 0 : index
    %c0_26 = arith.constant 0 : index
    %77 = vector.load %arg8[%c0_25, %c0_26] : memref<32x32xbf16, #tpu.memory_space<vmem>>, vector<32x32xbf16>
    %cst_27 = arith.constant dense<0.000000e+00> : vector<8x32xf32>
    %78 = tpu.matmul %76, %77, %cst_27 {dimension_numbers = #tpu.dot_dimension_numbers<[1], [0], [0], [1], [0, 0, 1, 1], [], []>} : vector<8x32xbf16>, vector<32x32xbf16>, vector<8x32xf32> -> vector<8x32xf32>
    %c0_28 = arith.constant 0 : index
    %c0_29 = arith.constant 0 : index
    %79 = vector.load %arg9[%c0_28, %c0_29] : memref<1x32xf32, #tpu.memory_space<vmem>>, vector<1x32xf32>
    %80 = vector.broadcast %79 : vector<1x32xf32> to vector<8x32xf32>
    %81 = arith.addf %78, %80 : vector<8x32xf32>
    %c0_30 = arith.constant 0 : index
    %c0_31 = arith.constant 0 : index
    %c0_32 = arith.constant 0 : index
    %82 = vector.load %arg10[%c0_30, %c0_31, %c0_32] : memref<1x8x32xf32, #tpu.memory_space<vmem>>, vector<1x8x32xf32>
    %83 = vector.shape_cast %82 : vector<1x8x32xf32> to vector<8x32xf32>
    %84 = vector.shape_cast %81 : vector<8x32xf32> to vector<1x8x32xf32>
    tpu.vector_store %arg10[%c0_30, %c0_31, %c0_32], %84 {strides = array<i32>} : memref<1x8x32xf32, #tpu.memory_space<vmem>>, vector<1x8x32xf32>,
    return
  }
  func.func @transform_0(%arg0: i32, %arg1: i32) -> (i32, i32, i32) {
    %c0_i32 = arith.constant 0 : i32
    %c0_i32_0 = arith.constant 0 : i32
    return %arg0, %arg1, %c0_i32 : i32, i32, i32
  }
  func.func @transform_1(%arg0: i32, %arg1: i32) -> (i32, i32, i32) {
    %c0_i32 = arith.constant 0 : i32
    %c0_i32_0 = arith.constant 0 : i32
    %c0_i32_1 = arith.constant 0 : i32
    return %arg0, %c0_i32, %c0_i32_0 : i32, i32, i32
  }
  func.func @transform_2(%arg0: i32, %arg1: i32) -> (i32, i32, i32) {
    %c0_i32 = arith.constant 0 : i32
    %c0_i32_0 = arith.constant 0 : i32
    %c0_i32_1 = arith.constant 0 : i32
    return %arg0, %c0_i32, %c0_i32_0 : i32, i32, i32
  }
  func.func @transform_3(%arg0: i32, %arg1: i32) -> (i32, i32) {
    %c0_i32 = arith.constant 0 : i32
    %c0_i32_0 = arith.constant 0 : i32
    %c0_i32_1 = arith.constant 0 : i32
    return %c0_i32, %c0_i32_0 : i32, i32
  }
  func.func @transform_4(%arg0: i32, %arg1: i32) -> (i32, i32) {
    %c0_i32 = arith.constant 0 : i32
    %c0_i32_0 = arith.constant 0 : i32
    %c0_i32_1 = arith.constant 0 : i32
    return %c0_i32, %c0_i32_0 : i32, i32
  }
  func.func @transform_5(%arg0: i32, %arg1: i32) -> (i32, i32) {
    %c0_i32 = arith.constant 0 : i32
    %c0_i32_0 = arith.constant 0 : i32
    %c0_i32_1 = arith.constant 0 : i32
    return %c0_i32, %c0_i32_0 : i32, i32
  }
  func.func @transform_6(%arg0: i32, %arg1: i32) -> (i32, i32) {
    %c0_i32 = arith.constant 0 : i32
    %c0_i32_0 = arith.constant 0 : i32
    %c0_i32_1 = arith.constant 0 : i32
    return %c0_i32, %c0_i32_0 : i32, i32
  }
  func.func @transform_7(%arg0: i32, %arg1: i32) -> (i32, i32) {
    %c0_i32 = arith.constant 0 : i32
    %c0_i32_0 = arith.constant 0 : i32
    %c0_i32_1 = arith.constant 0 : i32
    return %c0_i32, %c0_i32_0 : i32, i32
  }
  func.func @transform_8(%arg0: i32, %arg1: i32) -> (i32, i32, i32) {
    %c0_i32 = arith.constant 0 : i32
    %c0_i32_0 = arith.constant 0 : i32
    return %arg0, %arg1, %c0_i32 : i32, i32, i32
  }
}

</mosaic_0001>

<bundles_post_ra>
// kernel: tpu_custom_call.1
= control target key start
LH: loop header
LB: loop body
LE: loop exit
PB: predicated region body
PF: predicated region fallthrough
CT: control target
= control target key end

     0   :  { %s1903_s0 = inlined_call_operand.hbm [shape: f32[2,8,32], index: 0, kind: input, shape index: {}]   ;;  %s1904_s1 = inlined_call_operand.hbm [shape: f32[2,8,32], index: 1, kind: input, shape index: {}]   ;;  %s1905_s2 = inlined_call_operand.hbm [shape: f32[2,8,32], index: 2, kind: input, shape index: {}]   ;;  %s1906_s3 = inlined_call_operand.hbm [shape: bf16[32,32], index: 3, kind: input, shape index: {}]   ;;  %s1907_s4 = inlined_call_operand.hbm [shape: bf16[32,32], index: 4, kind: input, shape index: {}]   ;;  %s1908_s5 = inlined_call_operand.hbm [shape: bf16[32,32], index: 5, kind: input, shape index: {}]   ;;  %s1909_s6 = inlined_call_operand.hbm [shape: bf16[32,32], index: 6, kind: input, shape index: {}]   ;;  %s1910_s7 = inlined_call_operand.vmem [shape: f32[1,32], index: 7, kind: input, shape index: {}]   ;;  %s1911_s8 = inlined_call_operand.hbm [shape: f32[2,8,32], index: 8, kind: output, shape index: {}]  }
   0x1   :  { %1922 = sst [smem:[#allocation27_spill]] %s1903_s0 }
   0x2   :  { %1923 = sst [smem:[#allocation28_spill]] %s1904_s1 }
   0x3   :  { %1924 = sst [smem:[#allocation29_spill]] %s1906_s3 }
   0x4   :  { %1925 = sst [smem:[#allocation30_spill]] %s1907_s4 }
   0x5   :  { %1926 = sst [smem:[#allocation31_spill]] %s1908_s5 }
   0x6   :  { %1927 = sst [smem:[#allocation32_spill]] %s1909_s6 }
   0x7   :  { %13 = vsyncpa [#allocation5], 0 }
   0x8   :  { %15 = vsyncpa [#allocation5 + $0x1], 0 }
   0x9   :  { %16 = vsyncpa [#allocation8], 0 }
   0xa   :  { %18 = vsyncpa [#allocation8 + $0x1], 0 }
   0xb   :  { %19 = vsyncpa [#allocation11], 0 }
   0xc   :  { %20 = vsyncpa [#allocation14], 0 }
   0xd   :  { %21 = vsyncpa [#allocation6], 0 }
   0xe   :  { %23 = vsyncpa [#allocation6 + $0x1], 0  ;;  %s1640_s27 = smov 0   ;;  %s1642_s28 = smov 0  }
   0xf   :  { %s1644_s29 = smov 0   ;;  %s1646_s30 = smov 0  }
  0x10   :  { %s1648_s9 = smov 0   ;;  %s1650_s10 = smov 0  }
  0x11 LB: > { %1928 = sst [smem:[#allocation22_spill]] %s1577_s9  ;;  %s1671_s11 = sadd.s32 4294967295, %s1581_s10   ;;  %s1581_s10 = sphi %s1650_s10, %s29_s10   ;;  %s1577_s9 = sphi %s1648_s9, %s1953_s9   ;;  %s1573_s30 = sphi %s1646_s30, %s1952_s30   ;;  %s1569_s29 = sphi %s1644_s29, %s1956_s29   ;;  %s1565_s28 = sphi %s1642_s28, %s1955_s28   ;;  %s1561_s27 = sphi %s1640_s27, %s1954_s27  }
  0x12   : > { %1929 = sst [smem:[#allocation23_spill]] %s1581_s10  ;;  %p1062_p0 = scmp.ge.s32.totalorder %s1581_s10, 1 }
  0x13   : > { %p64_p1 = scmp.eq.s32.totalorder %s1671_s11, 0  ;;  %p259_p2 = scmp.lt.s32.totalorder %s1581_s10, 3 }
  0x14   : > { %s1930_s3 = sld [smem:[#allocation29_spill]]  ;;  %s1583_s16 = smov [#allocation10]  }
  0x15   : > { %p1679_p3 = pnand %p1062_p0, %p259_p2  ;;  %s272_s17 = sshll.u32 %s1583_s16, 4  ;;  %s273_s17 = int_to_ptr.vmem [resolvable:$true] %s272_s17 }
  0x16   : > { %p1067_p6 = scmp.ge.s32.totalorder %s1581_s10, 2  ;;  %s1933_s5 = sld [smem:[#allocation31_spill]] }
  0x17   : > { %p1163_p4 = pneg %p1679_p3  ;;  %s1912_s22 = smov 64  }
  0x18   : > { %s1914_s23 = smov 4   ;;  %s1586_s24 = smov [#allocation13]  }
  0x19   : > { %p1687_p5 = pnand %p1163_p4, %p64_p1  ;;  %s300_s25 = sshll.u32 %s1586_s24, 4  ;;  %s301_s25 = int_to_ptr.vmem [resolvable:$true] %s300_s25 }
  0x1a   : > { %s270_s14 = sshll.u32 %s1930_s3, 4  ;;  %s1061_s26 = sadd.s32 4294967294, %s1581_s10   ;;  %s271_s14 = int_to_ptr.hbm [resolvable:$true] %s270_s14 }
  0x1b   : > { %1166 = dma.hbm_to_vmem [thread:$0]  (!%p1687_p5), %s271_s14, 256, %s273_s17, [#allocation11], %s1912_s22, %s1912_s22, %s1914_s23  }
  0x1c   : > { %s298_s21 = sshll.u32 %s1933_s5, 4  ;;  %s41_s12 = sadd.s32 1, %s1577_s9  ;;  %s299_s21 = int_to_ptr.hbm [resolvable:$true] %s298_s21 }
  0x1d   : > { %1172 = dma.hbm_to_vmem [thread:$0]  (!%p1687_p5), %s299_s21, 256, %s301_s25, [#allocation14], %s1912_s22, %s1912_s22, %s1914_s23  }
  0x1e   : > { %p43_p7 = scmp.ge.s32.totalorder %s41_s12, 2  ;;  %s50_s13 = sadd.s32 1, %s1569_s29 }
  0x1f   : > { %p57_p8 = scmp.ne.s32.totalorder %s1569_s29, %s1565_s28  ;;  %p58_p9 = scmp.eq.s32.totalorder %s1581_s10, 0 }
  0x20   : > { %s1958_s12 = smov (%p43_p7, %s41_s12), 0  ;;  %p63_p11 = scmp.ne.s32.totalorder %s1565_s28, %s1561_s27 }
  0x21   : > { %1934 = sst [smem:[#allocation24_spill]] %s1958_s12  ;;  %p1713_p10 = por %p58_p9, %p57_p8 }
  0x22   : > { %s45_s16 = ssub.s32 %s1577_s9, %s1958_s12  ;;  %p246_p12 = scmp.eq.s32.totalorder %s1671_s11, 1 }
  0x23   : > { %p48_p13 = scmp.eq.s32.totalorder %s45_s16, 0  ;;  %p1724_p0 = por %p64_p1, %p63_p11 }
  0x24   : > { %p1728_p2 = por %p246_p12, %p57_p8  ;;  %p252_p4 = scmp.eq.s32.totalorder %s1061_s26, 1 }
  0x25   : > { %s1733_s20 = scalar_select %p48_p13, %s1569_s29, %s50_s13  }
  0x26   : > { %p1735_p7 = por %p252_p4, %p63_p11  ;;  %p1194_p9 = scmp.lt.s32.totalorder %s1581_s10, 2 }
  0x27   : > { %1938 = sst [smem:[#allocation25_spill]] %s1733_s20  ;;  %s1918_s24 = sand.u32 1, %s1569_s29  }
  0x28   : > { %s1939_s21 = scalar_select %p1735_p7, 1, 0 }
  0x29   : > { %s1742_s25 = sshll.u32 %s1577_s9, 3  ;;  %s1746_s16 = sshll.u32 %s1918_s24, 3 }
  0x2a   : > { %1940 = sst [smem:[#allocation26_spill]] %s1939_s21  ;;  %p1750_p8 = pnand %p1194_p9, %p1713_p10 }
  0x2b   : > { %s351_s26 = sand.u32 1, %s1581_s10   ;;  %s1942_s1 = sld [smem:[#allocation28_spill]] }
  0x2c   : > { %s355_s5 = scalar_lea.vmem [#allocation7], %s1746_s16  ;;  %s1943_s4 = sld [smem:[#allocation30_spill]] }
  0x2d   : > { %s363_s12 = sshll.u32 %s355_s5, 4  ;;  %s352_s21 = scalar_lea.sflag [#allocation8], %s351_s26  ;;  %s364_s12 = int_to_ptr.vmem [resolvable:$true] %s363_s12 }
  0x2e   : > { %s1587_s10 = smov [#allocation12]   ;;  %s1944_s6 = sld [smem:[#allocation32_spill]] }
  0x2f   : > { %s286_s23 = sshll.u32 %s1587_s10, 4  ;;  %s1945_s5 = smov 4   ;;  %s287_s23 = int_to_ptr.vmem [resolvable:$true] %s286_s23 }
  0x30   : > { %s1946_s24 = smov 64   ;;  %s1588_s26 = smov [#allocation15]  }
  0x31   : > { %s359_s3 = scalar_lea.hbm %s1942_s1, %s1742_s25  ;;  %s1947_s0 = sld [smem:[#allocation27_spill]] }
  0x32   : > { %s361_s9 = sshll.u32 %s359_s3, 4  ;;  %s284_s20 = sshll.u32 %s1943_s4, 4  ;;  %s362_s9 = int_to_ptr.hbm [resolvable:$true] %s361_s9  ;;  %s285_s20 = int_to_ptr.hbm [resolvable:$true] %s284_s20 }
  0x33   : > { %1182 = dma.hbm_to_vmem [thread:$0]  (!%p1750_p8), %s362_s9, 128, %s364_s12, %s352_s21  }
  0x34   : > { %s312_s3 = sshll.u32 %s1944_s6, 4  ;;  %s314_s9 = sshll.u32 %s1588_s26, 4  ;;  %s313_s3 = int_to_ptr.hbm [resolvable:$true] %s312_s3  ;;  %s315_s9 = int_to_ptr.vmem [resolvable:$true] %s314_s9 }
  0x35   : > { %1169 = dma.hbm_to_vmem [thread:$0]  (!%p1687_p5), %s285_s20, 256, %s287_s23, [#allocation11], %s1946_s24, %s1946_s24, %s1945_s5  }
  0x36   : > { %1175 = dma.hbm_to_vmem [thread:$0]  (!%p1687_p5), %s313_s3, 256, %s315_s9, [#allocation14], %s1946_s24, %s1946_s24, %s1945_s5  }
  0x37   : > { %s340_s10 = scalar_lea.hbm %s1947_s0, %s1742_s25  ;;  %s335_s13 = scalar_lea.vmem [#allocation4], %s1746_s16 }
  0x38   : > { %s342_s1 = sshll.u32 %s340_s10, 4  ;;  %s344_s4 = sshll.u32 %s335_s13, 4  ;;  %s343_s1 = int_to_ptr.hbm [resolvable:$true] %s342_s1  ;;  %s345_s4 = int_to_ptr.vmem [resolvable:$true] %s344_s4 }
  0x39   : > { %s1948_s6 = sand.u32 1, %s1569_s29   ;;  %s378_s12 = scalar_lea.hbm %s1905_s2, %s1742_s25 }
  0x3a   : > { %s332_s20 = scalar_lea.sflag [#allocation5], %s1948_s6  ;;  %s380_s14 = sshll.u32 %s378_s12, 4  ;;  %s381_s14 = int_to_ptr.hbm [resolvable:$true] %s380_s14 }
  0x3b   : > { %1179 = dma.hbm_to_vmem [thread:$0]  (!%p1750_p8), %s343_s1, 128, %s345_s4, %s332_s20  }
  0x3c   : > { %s374_s0 = scalar_lea.vmem [#allocation9], %s1746_s16  ;;  %391 = sbr.rel (%p1679_p3) target bundleno = 1002 (0x3ea), region = 52 }
  0x3d   : > { %s382_s18 = sshll.u32 %s374_s0, 4  ;;  %s1797_s3 = sand.u32 (!%p1679_p3), 1, %s1565_s28   ;;  %s383_s18 = int_to_ptr.vmem [resolvable:$true] %s382_s18 }
  0x3e   : > { %1185 = dma.hbm_to_vmem [thread:$0]  (!%p1750_p8), %s381_s14, 128, %s383_s18, %s352_s21  }
  0x3f   : > { %s1800_s4 = sshll.u32 (!%p1679_p3), %s1797_s3, 3  ;;  %s394_s6 = scalar_lea.sflag (!%p1679_p3), [#allocation5], %s1797_s3 }
  0x40   : > { %s397_s25 = scalar_lea.vmem (!%p1679_p3), [#allocation4], %s1800_s4 }
  0x41   : > { %1540 = dma.done.wait (%p1724_p0), %s394_s6, 128  }
  0x42   : > { %1542 = vsyncadd (%p1724_p0), %s394_s6, 4294967168  ;;  %s403_s0 = sand.u32 1, %s1671_s11   ;;  %s407_s22 = scalar_lea.vmem [#allocation7], %s1800_s4 }
  0x43   : > { %s404_s15 = scalar_lea.sflag [#allocation8], %s403_s0 }
  0x44   : > { %1544 = dma.done.wait (%p1724_p0), %s404_s15, 256  }
  0x45   : > { %1546 = vsyncadd (%p1724_p0), %s404_s15, 4294967040  ;;  %s417_s21 = scalar_lea.vmem [#allocation9], %s1800_s4 }
  0x46   : > { %1548 = dma.done.wait (%p64_p1), [#allocation11], 512  }
  0x47   : > { %1550 = vsyncadd (%p64_p1), [#allocation11], 4294966784 }
  0x48   : > { %1552 = dma.done.wait (%p64_p1), [#allocation14], 512  }
  0x49   : > { %1554 = vsyncadd (%p64_p1), [#allocation14], 4294966784  ;;  %v1132_v0 = vld [vmem:[#allocation12 + $0x8] sm:$0xff]  ;;  %v1136_v1 = vld [vmem:[#allocation10 + $0x8] sm:$0xff]  ;;  %vm506_vm0 = vcmask 261120   ;;  %vm524_vm1 = vcmask 257024  }
  0x4a   : > { %v1131_v2 = vld [vmem:[#allocation12] sm:$0xff]  ;;  %v1135_v3 = vld [vmem:[#allocation10] sm:$0xff]  ;;  %516 = vmatpush.bf16.msra.mxu0 %v1132_v0  ;;  %588 = vmatpush.bf16.msra.mxu2 %v1136_v1  ;;  %v1134_v8 = vld [vmem:[#allocation13 + $0x8] sm:$0xff]  ;;  %vm598_vm2 = vcmask 64512   ;;  %s1589_s11 = smov 112   ;;  %s1590_s17 = smov 120  }
  0x4b   : > { %v486_v4 = vld [vmem:[%s407_s22] sm:$0xff]  ;;  %v560_v5 = vld [vmem:[%s397_s25] sm:$0xff]  ;;  %551 = vmatpush.bf16.msra.mxu1 %v1134_v8  ;;  %s1591_s16 = smov 104   ;;  %vm631_vm3 = vcmask 1043456   ;;  %s1592_s5 = smov 8   ;;  %vm840_vm4 = vcmask 130048  }
  0x4c   : > { %v487_v6 = vpack.c.bf16 %v486_v4, %v486_v4  ;;  %v561_v7 = vpack.c.bf16 %v560_v5, %v560_v5  ;;  %v1133_v9 = vld [vmem:[#allocation13] sm:$0xff]  ;;  %v488_v10 = vld [vmem:[%s417_s21] sm:$0xff]  ;;  %s1593_s24 = smov 16   ;;  %s1594_s9 = smov 24   ;;  %vm842_vm5 = vcmask 195584  }
  0x4d   : > { %v489_v11 = vpack.c.bf16 %v488_v10, %v488_v10  ;;  %s1128_s10 = sshll.u32 %s1573_s30, 3  ;;  %s480_s12 = scalar_lea.vmem [#allocation16], %s1800_s4 }
  0x4e   : > { %517 = vmatpush.bf16.msra.mxu0 %v1131_v2  ;;  %589 = vmatpush.bf16.msra.mxu2 %v1135_v3  ;;  %s894_s20 = scalar_lea.hbm %s1911_s8, %s1128_s10  ;;  %s896_s14 = sshll.u32 %s480_s12, 4  ;;  %s897_s14 = int_to_ptr.vmem [resolvable:$true] %s896_s14 }
  0x4f   : > { %552 = vmatpush.bf16.msra.mxu1 %v1133_v9  ;;  %s898_s18 = sshll.u32 %s894_s20, 4  ;;  %s883_s6 = scalar_lea.sflag [#allocation6], %s1797_s3  ;;  %s899_s18 = int_to_ptr.hbm [resolvable:$true] %s898_s18 }
  0x50   : > { %s1501_s30 = sshra.s32 %s899_s18, 4  ;;  %s1507_s4 = scalar_lea.hbm %s1911_s8, 16  ;;  %s1502_s30 = int_to_ptr.hbm [resolvable:$true] %s1501_s30 }
  0x51   : > { %1091 = vmatmul.msk.bf16.vlgmr.msra.gmra.mxu0 %vm506_vm0, %v487_v6  ;;  %1109 = vmatmul.msk.bf16.vlgmr.msra.gmra.mxu2 %vm506_vm0, %v561_v7  ;;  %s1503_s25 = scalar_lea.hbm %s1502_s30, 8  ;;  %p1508_p10 = scmp.lt.s32.totalorder %s1502_s30, %s1911_s8 }
  0x52   : > { %1100 = vmatmul.msk.bf16.vlgmr.msra.gmra.mxu1 %vm506_vm0, %v489_v11  ;;  %p1504_p1 = scmp.ne.s32.totalorder %s1502_s30, %s1503_s25  ;;  %p1509_p11 = scmp.lt.s32.totalorder %s1507_s4, %s1503_s25 }
  0x54   : > { %p1505_p3 = pnand %p1504_p1, %p1728_p2  ;;  %p1510_p12 = por %p1509_p11, %p1508_p10 }
  0x56   : > { %p1506_p5 = pneg %p1505_p3 }
  0x58   : > { %p1511_p13 = pnand %p1510_p12, %p1506_p5 }
  0xce   : > { %v519_v12 = vpop.f32.mrf.mxu0 }
  0xcf   : > { %v523_v13 = vpack.c.bf16 %v519_v12, %v519_v12  ;;  %v554_v24 = vpop.f32.mrf.mxu1 }
  0xd0   : > { %v558_v25 = vpack.c.bf16 %v554_v24, %v554_v24 }
  0xd1   : > { %525 = vst.msk [vmem:[#allocation2] sm:$0xf] %vm524_vm1, %v523_v13 }
  0xd2   : > { %559 = vst.msk [vmem:[#allocation3] sm:$0xf] %vm524_vm1, %v558_v25 }
  0xd4   : > { %v591_v14 = vpop.f32.mrf.mxu2 }
  0xd5   : > { %v595_v15 = vpack.c.bf16 %v591_v14, %v591_v14 }
  0xd6   : > { %v521_v16 = vpop.f32.mrf.mxu0 }
  0xd7   : > { %v651_v17 = vunpack.c.l.b16 %v595_v15  ;;  %v556_v30 = vpop.f32.mrf.mxu1 }
  0xd8   : > { %v596_v18 = vld [vmem:[#allocation2] sm:$0xf] }
  0xd9   : > { %v652_v19 = vpack.c.b16 %v651_v17, %v651_v17  ;;  %v603_v20 = vsel %vm598_vm2, %v596_v18, 0  ;;  %v656_v21 = vunpack.c.l.b16 %v596_v18  ;;  %v597_v32 = vld [vmem:[#allocation3] sm:$0xf] }
  0xda   : > { %612 = vmatpush.bf16.xpose.msra.mxu3 %v603_v20  ;;  %v633_v35 = vsel %vm631_vm3, %v597_v32, 0  ;;  %v690_v36 = vunpack.c.l.b16 %v597_v32 }
  0xdb   : > { %v657_v22 = vpack.c.b16 %v656_v21, %v656_v21  ;;  %715 = vrot.lane.b32.xlu2 %v652_v19, %s1589_s11  ;;  %642 = vmatpush.bf16.msrb.mxu0 %v633_v35  ;;  %v1138_v35 = vld [vmem:[#allocation15 + $0x8] sm:$0xff] }
  0xdc   : > { %v593_v23 = vpop.f32.mrf.mxu2  ;;  %v691_v38 = vpack.c.b16 %v690_v36, %v690_v36  ;;  %v1137_v36 = vld [vmem:[#allocation15] sm:$0xff] }
  0xdd   : > { %717 = vrot.lane.b32.xlu1 %v657_v22, %s1589_s11  ;;  %658 = vrot.lane.b32.xlu0 %v657_v22, %s1590_s17 }
  0xe1   : > { %1110 = vmatmul.msk.bf16.vlgmr.msra.gmra.mxu3 %vm598_vm2, %v595_v15 }
  0xe3   : > { %771 = vrot.lane.b32.xlu2 %v652_v19, %s1591_s16 }
  0xe5   : > { %773 = vrot.lane.b32.xlu1 %v657_v22, %s1591_s16  ;;  %653 = vrot.lane.b32.xlu0 %v652_v19, %s1590_s17 }
  0xeb   : > { %692 = vrot.lane.b32.xlu2 %v691_v38, %s1590_s17 }
 0x135   : > { %v716_v31 = vpop.permute.xlu2 %715 }
 0x13d   : > { %v772_v41 = vpop.permute.xlu2 %771 }
 0x145   : > { %v693_v51 = vpop.permute.xlu2 %692 }
 0x146   : > { %v698_v52 = vsel %vm631_vm3, %v693_v51, 0 }
 0x147   : > { %707 = vmatpush.bf16.msrb.mxu2 %v698_v52 }
 0x14f   : > { %v718_v26 = vpop.permute.xlu1 %717  ;;  %v659_v27 = vpop.permute.xlu0 %658 }
 0x150   : > { %v664_v28 = vsel %vm598_vm2, %v659_v27, 0  ;;  %v723_v29 = vsel %vm598_vm2, %v718_v26, 0 }
 0x151   : > { %673 = vmatpush.bf16.xpose.msrb.mxu1 %v664_v28  ;;  %732 = vmatpush.bf16.xpose.msrb.mxu3 %v723_v29 }
 0x157   : > { %v774_v33 = vpop.permute.xlu1 %773  ;;  %v654_v34 = vpop.permute.xlu0 %653 }
 0x158   : > { %v779_v37 = vsel %vm598_vm2, %v774_v33, 0  ;;  %1112 = vmatmul.msk.bf16.vlgmr.msrb.gmra.mxu1 %vm598_vm2, %v654_v34  ;;  %1114 = vmatmul.msk.bf16.vlgmr.msrb.gmra.mxu3 %vm598_vm2, %v716_v31 }
 0x159   : > { %788 = vmatpush.bf16.xpose.msra.mxu1 %v779_v37  ;;  %874 = vmatpush.bf16.msra.mxu3 %v1138_v35 }
 0x15d   : > { %875 = vmatpush.bf16.msra.mxu3 %v1137_v36 }
 0x164   : > { %v614_v39 = vpop.f32.mrf.mxu3 }
 0x165   : > { %v618_v40 = vsel %vm598_vm2, %v614_v39, -inf }
 0x166   : > { %619 = vmax.xlane.f32.xlu1 %v618_v40 }
 0x168   : > { %1116 = vmatmul.msk.bf16.vlgmr.msra.gmra.mxu1 %vm598_vm2, %v772_v41 }
 0x16c   : > { %v616_v42 = vpop.f32.mrf.mxu3 }
 0x17f   : > { %804 = vrot.lane.b32.xlu1 %v691_v38, %s1591_s16 }
 0x1d5   : > { %v675_v43 = vpop.f32.mrf.mxu1 }
 0x1d6   : > { %v679_v44 = vsel %vm598_vm2, %v675_v43, -inf }
 0x1d7   : > { %680 = vmax.xlane.f32.xlu0 %v679_v44 }
 0x1d9   : > { %v620_v45 = vpop.xlane.xlu1 %619 }
 0x1da   : > { %v621_v46 = vsub.f32 %v614_v39, %v620_v45 }
 0x1db   : > { %v734_v47 = vpop.f32.mrf.mxu3 }
 0x1dc   : > { %v622_v48 = vmul.f32 1.442695, %v621_v46  ;;  %v738_v50 = vsel %vm598_vm2, %v734_v47, -inf }
 0x1dd   : > { %v677_v49 = vpop.f32.mrf.mxu1 }
 0x1de   : > { %1261 = vpow2.f32 %v622_v48 }
 0x1df   : > { %739 = vmax.xlane.f32.xlu0 %v738_v50 }
 0x1e3   : > { %v736_v53 = vpop.f32.mrf.mxu3 }
 0x1e4   : > { %v1262_v54 = vpop.eup %1261 }
 0x1e5   : > { %v790_v55 = vpop.f32.mrf.mxu1  ;;  %v624_v56 = vsel %vm598_vm2, %v1262_v54, 0.0  ;;  %v627_v57 = vpack.c.bf16 %v1262_v54, %v1262_v54 }
 0x1e6   : > { %625 = vadd.xlane.f32.xlu1 %v624_v56  ;;  %v794_v58 = vsel %vm598_vm2, %v790_v55, -inf }
 0x1e7   : > { %795 = vmax.xlane.f32.xlu2 %v794_v58  ;;  %1111 = vmatmul.msk.bf16.vlgmr.msrb.gmra.mxu0 %vm598_vm2, %v627_v57 }
 0x1ed   : > { %v792_v59 = vpop.f32.mrf.mxu1 }
 0x1f1   : > { %v805_v60 = vpop.permute.xlu1 %804 }
 0x1f2   : > { %v810_v61 = vsel %vm631_vm3, %v805_v60, 0 }
 0x1f3   : > { %819 = vmatpush.bf16.msra.mxu2 %v810_v61 }
 0x1ff   : > { %748 = vrot.lane.b32.xlu2 %v691_v38, %s1589_s11 }
 0x24a   : > { %v681_v62 = vpop.xlane.xlu0 %680 }
 0x24b   : > { %v682_v63 = vsub.f32 %v675_v43, %v681_v62 }
 0x24d   : > { %v683_v0 = vmul.f32 1.442695, %v682_v63 }
 0x24f   : > { %1263 = vpow2.f32 %v683_v0 }
 0x252   : > { %v740_v1 = vpop.xlane.xlu0 %739 }
 0x253   : > { %v741_v2 = vsub.f32 %v734_v47, %v740_v1  ;;  %v1260_v47 = vld [vmem:[%s1910_s7] ss:$0 sm:$0xff] }
 0x255   : > { %v1264_v3 = vpop.eup %1263  ;;  %v742_v4 = vmul.f32 1.442695, %v741_v2 }
 0x256   : > { %v685_v5 = vsel %vm598_vm2, %v1264_v3, 0.0  ;;  %v688_v6 = vpack.c.bf16 %v1264_v3, %v1264_v3 }
 0x257   : > { %1265 = vpow2.f32 %v742_v4  ;;  %686 = vadd.xlane.f32.xlu0 %v685_v5 }
 0x258   : > { %1113 = vmatmul.msk.bf16.vlgmr.msrb.gmra.mxu2 %vm598_vm2, %v688_v6 }
 0x259   : > { %v626_v37 = vpop.xlane.xlu1 %625 }
 0x25a   : > { %v796_v7 = vpop.xlane.xlu2 %795 }
 0x25b   : > { %v797_v8 = vsub.f32 %v790_v55, %v796_v7 }
 0x25d   : > { %v1266_v9 = vpop.eup %1265  ;;  %v798_v10 = vmul.f32 1.442695, %v797_v8 }
 0x25e   : > { %v744_v11 = vsel %vm598_vm2, %v1266_v9, 0.0  ;;  %v747_v16 = vpack.c.bf16 %v1266_v9, %v1266_v9 }
 0x25f   : > { %1267 = vpow2.f32 %v798_v10  ;;  %745 = vadd.xlane.f32.xlu0 %v744_v11 }
 0x262   : > { %v749_v12 = vpop.permute.xlu2 %748 }
 0x263   : > { %v754_v13 = vsel %vm631_vm3, %v749_v12, 0 }
 0x264   : > { %v644_v14 = vpop.f32.mrf.mxu0  ;;  %763 = vmatpush.bf16.msra.mxu0 %v754_v13 }
 0x265   : > { %v1268_v15 = vpop.eup %1267 }
 0x266   : > { %v803_v17 = vpack.c.bf16 %v1268_v15, %v1268_v15  ;;  %v800_v18 = vsel %vm598_vm2, %v1268_v15, 0.0 }
 0x267   : > { %1115 = vmatmul.msk.bf16.vlgmr.msra.gmra.mxu0 %vm598_vm2, %v747_v16  ;;  %801 = vadd.xlane.f32.xlu0 %v800_v18 }
 0x268   : > { %1117 = vmatmul.msk.bf16.vlgmr.msra.gmra.mxu2 %vm598_vm2, %v803_v17 }
 0x26c   : > { %v646_v19 = vpop.f32.mrf.mxu0 }
 0x2ca   : > { %v687_v20 = vpop.xlane.xlu0 %686 }
 0x2cb   : > { %1269 = vrcp.f32 %v687_v20 }
 0x2d1   : > { %v1270_v22 = vpop.eup %1269 }
 0x2d2   : > { %v746_v21 = vpop.xlane.xlu0 %745 }
 0x2d3   : > { %1271 = vrcp.f32 %v746_v21 }
 0x2d9   : > { %v1272_v27 = vpop.eup %1271 }
 0x2da   : > { %v802_v25 = vpop.xlane.xlu0 %801 }
 0x2db   : > { %v709_v23 = vpop.f32.mrf.mxu2  ;;  %1273 = vrcp.f32 %v802_v25 }
 0x2dc   : > { %v714_v24 = vmul.f32 %v1270_v22, %v709_v23  ;;  %1275 = vrcp.f32 %v626_v37 }
 0x2de   : > { %828 = vrot.lane.b32.xlu2 %v714_v24, %s1592_s5 }
 0x2e1   : > { %v1274_v30 = vpop.eup %1273 }
 0x2e2   : > { %v1276_v39 = vpop.eup %1275 }
 0x2e3   : > { %v711_v26 = vpop.f32.mrf.mxu2  ;;  %v649_v40 = vmul.f32 %v1276_v39, %v644_v14 }
 0x2e4   : > { %v765_v28 = vpop.f32.mrf.mxu0 }
 0x2e5   : > { %v770_v29 = vmul.f32 %v1272_v27, %v765_v28 }
 0x2e7   : > { %832 = vrot.lane.b32.xlu0 %v770_v29, %s1593_s24 }
 0x2eb   : > { %v821_v31 = vpop.f32.mrf.mxu2 }
 0x2ec   : > { %v826_v32 = vmul.f32 %v1274_v30, %v821_v31  ;;  %v767_v33 = vpop.f32.mrf.mxu0 }
 0x2ee   : > { %836 = vrot.lane.b32.xlu2 %v826_v32, %s1594_s9 }
 0x2f3   : > { %v823_v34 = vpop.f32.mrf.mxu2 }
 0x338   : > { %v829_v38 = vpop.permute.xlu2 %828 }
 0x339   : > { %v839_v41 = vsel %vm598_vm2, %v649_v40, %v829_v38 }
 0x348   : > { %v837_v43 = vpop.permute.xlu2 %836 }
 0x359   : > { %v833_v42 = vpop.permute.xlu0 %832 }
 0x35a   : > { %v841_v44 = vsel %vm840_vm4, %v839_v41, %v833_v42 }
 0x35b   : > { %v843_v45 = vsel %vm842_vm5, %v841_v44, %v837_v43 }
 0x35c   : > { %v844_v46 = vpack.c.bf16 %v843_v45, %v843_v45 }
 0x35e   : > { %1126 = vmatmul.msk.bf16.vlgmr.msra.gmra.mxu3 %vm506_vm0, %v844_v46 }
 0x3e1   : > { %v877_v48 = vpop.f32.mrf.mxu3 }
 0x3e2   : > { %v878_v49 = vadd.f32 %v1260_v47, %v877_v48 }
 0x3e4   : > { %881 = vst.msk [vmem:[%s480_s12] sm:$0xff] %vm506_vm0, %v878_v49 }
 0x3e5   : > { %1514 = shalt.err (!%p1511_p13)
}
 0x3e6   : > { %1161 = dma.vmem_to_hbm [thread:$0]  (%p1728_p2), %s897_s14, 128, %s899_s18, %s883_s6  }
 0x3e9   : > { %v879_v50 = vpop.f32.mrf.mxu3 }
 0x3ea PF: > { %s1950_s11 = sld [smem:[#allocation23_spill]]  ;;  %s910_s17 = sand.u32 1, %s1561_s27  }
 0x3eb   : > { %p1187_p0 = pnand %p1067_p6, %p1735_p7  ;;  %s911_s16 = scalar_lea.sflag [#allocation6], %s910_s17 }
 0x3ed   : > { %p1188_p4 = pneg %p1187_p0 }
 0x3ef   : > { %1556 = dma.done.wait (%p1188_p4), %s911_s16, 128  }
 0x3f0   : > { %1558 = vsyncadd (%p1188_p4), %s911_s16, 4294967168  ;;  %s29_s10 = sadd.s32 1, %s1950_s11   ;;  %s1951_s19 = sld [smem:[#allocation25_spill]] }
 0x3f1   : > { %p26_p9 = scmp.ge.s32.totalorder %s29_s10, 4   ;;  %s1952_s30 = sld [smem:[#allocation22_spill]] }
 0x3f2   : > { %s1953_s9 = sld [smem:[#allocation24_spill]]  ;;  %s1954_s27 = smov %s1565_s28 }
 0x3f3   : > { %s1955_s28 = smov %s1569_s29  ;;  %28 = sbr.rel (!%p26_p9) target bundleno = 17 (0x11), region = 141 }
 0x3f6   : > { %s1956_s29 = smov %s1951_s19 }
 0x3f8   :  { %917 = vsyncpa [#allocation5], 1 }
 0x3f9   :  { %919 = vsyncpa [#allocation5 + $0x1], 1 }
 0x3fa   :  { %920 = vsyncpa [#allocation8], 1 }
 0x3fb   :  { %922 = vsyncpa [#allocation8 + $0x1], 1 }
 0x3fc   :  { %923 = vsyncpa [#allocation11], 1 }
 0x3fd   :  { %924 = vsyncpa [#allocation14], 1 }
 0x3fe   :  { %925 = vsyncpa [#allocation6], 1 }
 0x3ff   :  { %927 = vsyncpa [#allocation6 + $0x1], 1 }

// kernel: tpu_custom_call.1
= control target key start
LH: loop header
LB: loop body
LE: loop exit
PB: predicated region body
PF: predicated region fallthrough
CT: control target
= control target key end

     0   :  { %s1903_s0 = inlined_call_operand.hbm [shape: f32[2,8,32], index: 0, kind: input, shape index: {}]   ;;  %s1904_s1 = inlined_call_operand.hbm [shape: f32[2,8,32], index: 1, kind: input, shape index: {}]   ;;  %s1905_s2 = inlined_call_operand.hbm [shape: f32[2,8,32], index: 2, kind: input, shape index: {}]   ;;  %s1906_s3 = inlined_call_operand.hbm [shape: bf16[32,32], index: 3, kind: input, shape index: {}]   ;;  %s1907_s4 = inlined_call_operand.hbm [shape: bf16[32,32], index: 4, kind: input, shape index: {}]   ;;  %s1908_s5 = inlined_call_operand.hbm [shape: bf16[32,32], index: 5, kind: input, shape index: {}]   ;;  %s1909_s6 = inlined_call_operand.hbm [shape: bf16[32,32], index: 6, kind: input, shape index: {}]   ;;  %s1910_s7 = inlined_call_operand.vmem [shape: f32[1,32], index: 7, kind: input, shape index: {}]   ;;  %s1911_s8 = inlined_call_operand.hbm [shape: f32[2,8,32], index: 8, kind: output, shape index: {}]  }
   0x1   :  { %1922 = sst [smem:[#allocation27_spill]] %s1903_s0 }
   0x2   :  { %1923 = sst [smem:[#allocation28_spill]] %s1904_s1 }
   0x3   :  { %1924 = sst [smem:[#allocation29_spill]] %s1906_s3 }
   0x4   :  { %1925 = sst [smem:[#allocation30_spill]] %s1907_s4 }
   0x5   :  { %1926 = sst [smem:[#allocation31_spill]] %s1908_s5 }
   0x6   :  { %1927 = sst [smem:[#allocation32_spill]] %s1909_s6 }
   0x7   :  { %13 = vsyncpa [#allocation5], 0 }
   0x8   :  { %15 = vsyncpa [#allocation5 + $0x1], 0 }
   0x9   :  { %16 = vsyncpa [#allocation8], 0 }
   0xa   :  { %18 = vsyncpa [#allocation8 + $0x1], 0 }
   0xb   :  { %19 = vsyncpa [#allocation11], 0 }
   0xc   :  { %20 = vsyncpa [#allocation14], 0 }
   0xd   :  { %21 = vsyncpa [#allocation6], 0 }
   0xe   :  { %23 = vsyncpa [#allocation6 + $0x1], 0  ;;  %s1640_s27 = smov 0   ;;  %s1642_s28 = smov 0  }
   0xf   :  { %s1644_s29 = smov 0   ;;  %s1646_s30 = smov 0  }
  0x10   :  { %s1648_s9 = smov 0   ;;  %s1650_s10 = smov 0  }
  0x11 LB: > { %1928 = sst [smem:[#allocation22_spill]] %s1577_s9  ;;  %s1671_s11 = sadd.s32 4294967295, %s1581_s10   ;;  %s1581_s10 = sphi %s1650_s10, %s29_s10   ;;  %s1577_s9 = sphi %s1648_s9, %s1953_s9   ;;  %s1573_s30 = sphi %s1646_s30, %s1952_s30   ;;  %s1569_s29 = sphi %s1644_s29, %s1956_s29   ;;  %s1565_s28 = sphi %s1642_s28, %s1955_s28   ;;  %s1561_s27 = sphi %s1640_s27, %s1954_s27  }
  0x12   : > { %1929 = sst [smem:[#allocation23_spill]] %s1581_s10  ;;  %p1062_p0 = scmp.ge.s32.totalorder %s1581_s10, 1 }
  0x13   : > { %p64_p1 = scmp.eq.s32.totalorder %s1671_s11, 0  ;;  %p259_p2 = scmp.lt.s32.totalorder %s1581_s10, 3 }
  0x14   : > { %s1930_s3 = sld [smem:[#allocation29_spill]]  ;;  %s1583_s16 = smov [#allocation10]  }
  0x15   : > { %p1679_p3 = pnand %p1062_p0, %p259_p2  ;;  %s272_s17 = sshll.u32 %s1583_s16, 4  ;;  %s273_s17 = int_to_ptr.vmem [resolvable:$true] %s272_s17 }
  0x16   : > { %p1067_p6 = scmp.ge.s32.totalorder %s1581_s10, 2  ;;  %s1933_s5 = sld [smem:[#allocation31_spill]] }
  0x17   : > { %p1163_p4 = pneg %p1679_p3  ;;  %s1912_s22 = smov 64  }
  0x18   : > { %s1914_s23 = smov 4   ;;  %s1586_s24 = smov [#allocation13]  }
  0x19   : > { %p1687_p5 = pnand %p1163_p4, %p64_p1  ;;  %s300_s25 = sshll.u32 %s1586_s24, 4  ;;  %s301_s25 = int_to_ptr.vmem [resolvable:$true] %s300_s25 }
  0x1a   : > { %s270_s14 = sshll.u32 %s1930_s3, 4  ;;  %s1061_s26 = sadd.s32 4294967294, %s1581_s10   ;;  %s271_s14 = int_to_ptr.hbm [resolvable:$true] %s270_s14 }
  0x1b   : > { %1166 = dma.hbm_to_vmem [thread:$0]  (!%p1687_p5), %s271_s14, 256, %s273_s17, [#allocation11], %s1912_s22, %s1912_s22, %s1914_s23  }
  0x1c   : > { %s298_s21 = sshll.u32 %s1933_s5, 4  ;;  %s41_s12 = sadd.s32 1, %s1577_s9  ;;  %s299_s21 = int_to_ptr.hbm [resolvable:$true] %s298_s21 }
  0x1d   : > { %1172 = dma.hbm_to_vmem [thread:$0]  (!%p1687_p5), %s299_s21, 256, %s301_s25, [#allocation14], %s1912_s22, %s1912_s22, %s1914_s23  }
  0x1e   : > { %p43_p7 = scmp.ge.s32.totalorder %s41_s12, 2  ;;  %s50_s13 = sadd.s32 1, %s1569_s29 }
  0x1f   : > { %p57_p8 = scmp.ne.s32.totalorder %s1569_s29, %s1565_s28  ;;  %p58_p9 = scmp.eq.s32.totalorder %s1581_s10, 0 }
  0x20   : > { %s1958_s12 = smov (%p43_p7, %s41_s12), 0  ;;  %p63_p11 = scmp.ne.s32.totalorder %s1565_s28, %s1561_s27 }
  0x21   : > { %1934 = sst [smem:[#allocation24_spill]] %s1958_s12  ;;  %p1713_p10 = por %p58_p9, %p57_p8 }
  0x22   : > { %s45_s16 = ssub.s32 %s1577_s9, %s1958_s12  ;;  %p246_p12 = scmp.eq.s32.totalorder %s1671_s11, 1 }
  0x23   : > { %p48_p13 = scmp.eq.s32.totalorder %s45_s16, 0  ;;  %p1724_p0 = por %p64_p1, %p63_p11 }
  0x24   : > { %p1728_p2 = por %p246_p12, %p57_p8  ;;  %p252_p4 = scmp.eq.s32.totalorder %s1061_s26, 1 }
  0x25   : > { %s1733_s20 = scalar_select %p48_p13, %s1569_s29, %s50_s13  }
  0x26   : > { %p1735_p7 = por %p252_p4, %p63_p11  ;;  %p1194_p9 = scmp.lt.s32.totalorder %s1581_s10, 2 }
  0x27   : > { %1938 = sst [smem:[#allocation25_spill]] %s1733_s20  ;;  %s1918_s24 = sand.u32 1, %s1569_s29  }
  0x28   : > { %s1939_s21 = scalar_select %p1735_p7, 1, 0 }
  0x29   : > { %s1742_s25 = sshll.u32 %s1577_s9, 3  ;;  %s1746_s16 = sshll.u32 %s1918_s24, 3 }
  0x2a   : > { %1940 = sst [smem:[#allocation26_spill]] %s1939_s21  ;;  %p1750_p8 = pnand %p1194_p9, %p1713_p10 }
  0x2b   : > { %s351_s26 = sand.u32 1, %s1581_s10   ;;  %s1942_s1 = sld [smem:[#allocation28_spill]] }
  0x2c   : > { %s355_s5 = scalar_lea.vmem [#allocation7], %s1746_s16  ;;  %s1943_s4 = sld [smem:[#allocation30_spill]] }
  0x2d   : > { %s363_s12 = sshll.u32 %s355_s5, 4  ;;  %s352_s21 = scalar_lea.sflag [#allocation8], %s351_s26  ;;  %s364_s12 = int_to_ptr.vmem [resolvable:$true] %s363_s12 }
  0x2e   : > { %s1587_s10 = smov [#allocation12]   ;;  %s1944_s6 = sld [smem:[#allocation32_spill]] }
  0x2f   : > { %s286_s23 = sshll.u32 %s1587_s10, 4  ;;  %s1945_s5 = smov 4   ;;  %s287_s23 = int_to_ptr.vmem [resolvable:$true] %s286_s23 }
  0x30   : > { %s1946_s24 = smov 64   ;;  %s1588_s26 = smov [#allocation15]  }
  0x31   : > { %s359_s3 = scalar_lea.hbm %s1942_s1, %s1742_s25  ;;  %s1947_s0 = sld [smem:[#allocation27_spill]] }
  0x32   : > { %s361_s9 = sshll.u32 %s359_s3, 4  ;;  %s284_s20 = sshll.u32 %s1943_s4, 4  ;;  %s362_s9 = int_to_ptr.hbm [resolvable:$true] %s361_s9  ;;  %s285_s20 = int_to_ptr.hbm [resolvable:$true] %s284_s20 }
  0x33   : > { %1182 = dma.hbm_to_vmem [thread:$0]  (!%p1750_p8), %s362_s9, 128, %s364_s12, %s352_s21  }
  0x34   : > { %s312_s3 = sshll.u32 %s1944_s6, 4  ;;  %s314_s9 = sshll.u32 %s1588_s26, 4  ;;  %s313_s3 = int_to_ptr.hbm [resolvable:$true] %s312_s3  ;;  %s315_s9 = int_to_ptr.vmem [resolvable:$true] %s314_s9 }
  0x35   : > { %1169 = dma.hbm_to_vmem [thread:$0]  (!%p1687_p5), %s285_s20, 256, %s287_s23, [#allocation11], %s1946_s24, %s1946_s24, %s1945_s5  }
  0x36   : > { %1175 = dma.hbm_to_vmem [thread:$0]  (!%p1687_p5), %s313_s3, 256, %s315_s9, [#allocation14], %s1946_s24, %s1946_s24, %s1945_s5  }
  0x37   : > { %s340_s10 = scalar_lea.hbm %s1947_s0, %s1742_s25  ;;  %s335_s13 = scalar_lea.vmem [#allocation4], %s1746_s16 }
  0x38   : > { %s342_s1 = sshll.u32 %s340_s10, 4  ;;  %s344_s4 = sshll.u32 %s335_s13, 4  ;;  %s343_s1 = int_to_ptr.hbm [resolvable:$true] %s342_s1  ;;  %s345_s4 = int_to_ptr.vmem [resolvable:$true] %s344_s4 }
  0x39   : > { %s1948_s6 = sand.u32 1, %s1569_s29   ;;  %s378_s12 = scalar_lea.hbm %s1905_s2, %s1742_s25 }
  0x3a   : > { %s332_s20 = scalar_lea.sflag [#allocation5], %s1948_s6  ;;  %s380_s14 = sshll.u32 %s378_s12, 4  ;;  %s381_s14 = int_to_ptr.hbm [resolvable:$true] %s380_s14 }
  0x3b   : > { %1179 = dma.hbm_to_vmem [thread:$0]  (!%p1750_p8), %s343_s1, 128, %s345_s4, %s332_s20  }
  0x3c   : > { %s374_s0 = scalar_lea.vmem [#allocation9], %s1746_s16  ;;  %391 = sbr.rel (%p1679_p3) target bundleno = 1002 (0x3ea), region = 52 }
  0x3d   : > { %s382_s18 = sshll.u32 %s374_s0, 4  ;;  %s1797_s3 = sand.u32 (!%p1679_p3), 1, %s1565_s28   ;;  %s383_s18 = int_to_ptr.vmem [resolvable:$true] %s382_s18 }
  0x3e   : > { %1185 = dma.hbm_to_vmem [thread:$0]  (!%p1750_p8), %s381_s14, 128, %s383_s18, %s352_s21  }
  0x3f   : > { %s1800_s4 = sshll.u32 (!%p1679_p3), %s1797_s3, 3  ;;  %s394_s6 = scalar_lea.sflag (!%p1679_p3), [#allocation5], %s1797_s3 }
  0x40   : > { %s397_s25 = scalar_lea.vmem (!%p1679_p3), [#allocation4], %s1800_s4 }
  0x41   : > { %1540 = dma.done.wait (%p1724_p0), %s394_s6, 128  }
  0x42   : > { %1542 = vsyncadd (%p1724_p0), %s394_s6, 4294967168  ;;  %s403_s0 = sand.u32 1, %s1671_s11   ;;  %s407_s22 = scalar_lea.vmem [#allocation7], %s1800_s4 }
  0x43   : > { %s404_s15 = scalar_lea.sflag [#allocation8], %s403_s0 }
  0x44   : > { %1544 = dma.done.wait (%p1724_p0), %s404_s15, 256  }
  0x45   : > { %1546 = vsyncadd (%p1724_p0), %s404_s15, 4294967040  ;;  %s417_s21 = scalar_lea.vmem [#allocation9], %s1800_s4 }
  0x46   : > { %1548 = dma.done.wait (%p64_p1), [#allocation11], 512  }
  0x47   : > { %1550 = vsyncadd (%p64_p1), [#allocation11], 4294966784 }
  0x48   : > { %1552 = dma.done.wait (%p64_p1), [#allocation14], 512  }
  0x49   : > { %1554 = vsyncadd (%p64_p1), [#allocation14], 4294966784  ;;  %v1132_v0 = vld [vmem:[#allocation12 + $0x8] sm:$0xff]  ;;  %v1136_v1 = vld [vmem:[#allocation10 + $0x8] sm:$0xff]  ;;  %vm506_vm0 = vcmask 261120   ;;  %vm524_vm1 = vcmask 257024  }
  0x4a   : > { %v1131_v2 = vld [vmem:[#allocation12] sm:$0xff]  ;;  %v1135_v3 = vld [vmem:[#allocation10] sm:$0xff]  ;;  %516 = vmatpush.bf16.msra.mxu0 %v1132_v0  ;;  %588 = vmatpush.bf16.msra.mxu2 %v1136_v1  ;;  %v1134_v8 = vld [vmem:[#allocation13 + $0x8] sm:$0xff]  ;;  %vm598_vm2 = vcmask 64512   ;;  %s1589_s11 = smov 112   ;;  %s1590_s17 = smov 120  }
  0x4b   : > { %v486_v4 = vld [vmem:[%s407_s22] sm:$0xff]  ;;  %v560_v5 = vld [vmem:[%s397_s25] sm:$0xff]  ;;  %551 = vmatpush.bf16.msra.mxu1 %v1134_v8  ;;  %s1591_s16 = smov 104   ;;  %vm631_vm3 = vcmask 1043456   ;;  %s1592_s5 = smov 8   ;;  %vm840_vm4 = vcmask 130048  }
  0x4c   : > { %v487_v6 = vpack.c.bf16 %v486_v4, %v486_v4  ;;  %v561_v7 = vpack.c.bf16 %v560_v5, %v560_v5  ;;  %v1133_v9 = vld [vmem:[#allocation13] sm:$0xff]  ;;  %v488_v10 = vld [vmem:[%s417_s21] sm:$0xff]  ;;  %s1593_s24 = smov 16   ;;  %s1594_s9 = smov 24   ;;  %vm842_vm5 = vcmask 195584  }
  0x4d   : > { %v489_v11 = vpack.c.bf16 %v488_v10, %v488_v10  ;;  %s1128_s10 = sshll.u32 %s1573_s30, 3  ;;  %s480_s12 = scalar_lea.vmem [#allocation16], %s1800_s4 }
  0x4e   : > { %517 = vmatpush.bf16.msra.mxu0 %v1131_v2  ;;  %589 = vmatpush.bf16.msra.mxu2 %v1135_v3  ;;  %s894_s20 = scalar_lea.hbm %s1911_s8, %s1128_s10  ;;  %s896_s14 = sshll.u32 %s480_s12, 4  ;;  %s897_s14 = int_to_ptr.vmem [resolvable:$true] %s896_s14 }
  0x4f   : > { %552 = vmatpush.bf16.msra.mxu1 %v1133_v9  ;;  %s898_s18 = sshll.u32 %s894_s20, 4  ;;  %s883_s6 = scalar_lea.sflag [#allocation6], %s1797_s3  ;;  %s899_s18 = int_to_ptr.hbm [resolvable:$true] %s898_s18 }
  0x50   : > { %s1501_s30 = sshra.s32 %s899_s18, 4  ;;  %s1507_s4 = scalar_lea.hbm %s1911_s8, 16  ;;  %s1502_s30 = int_to_ptr.hbm [resolvable:$true] %s1501_s30 }
  0x51   : > { %1091 = vmatmul.msk.bf16.vlgmr.msra.gmra.mxu0 %vm506_vm0, %v487_v6  ;;  %1109 = vmatmul.msk.bf16.vlgmr.msra.gmra.mxu2 %vm506_vm0, %v561_v7  ;;  %s1503_s25 = scalar_lea.hbm %s1502_s30, 8  ;;  %p1508_p10 = scmp.lt.s32.totalorder %s1502_s30, %s1911_s8 }
  0x52   : > { %1100 = vmatmul.msk.bf16.vlgmr.msra.gmra.mxu1 %vm506_vm0, %v489_v11  ;;  %p1504_p1 = scmp.ne.s32.totalorder %s1502_s30, %s1503_s25  ;;  %p1509_p11 = scmp.lt.s32.totalorder %s1507_s4, %s1503_s25 }
  0x54   : > { %p1505_p3 = pnand %p1504_p1, %p1728_p2  ;;  %p1510_p12 = por %p1509_p11, %p1508_p10 }
  0x56   : > { %p1506_p5 = pneg %p1505_p3 }
  0x58   : > { %p1511_p13 = pnand %p1510_p12, %p1506_p5 }
  0xce   : > { %v519_v12 = vpop.f32.mrf.mxu0 }
  0xcf   : > { %v523_v13 = vpack.c.bf16 %v519_v12, %v519_v12  ;;  %v554_v24 = vpop.f32.mrf.mxu1 }
  0xd0   : > { %v558_v25 = vpack.c.bf16 %v554_v24, %v554_v24 }
  0xd1   : > { %525 = vst.msk [vmem:[#allocation2] sm:$0xf] %vm524_vm1, %v523_v13 }
  0xd2   : > { %559 = vst.msk [vmem:[#allocation3] sm:$0xf] %vm524_vm1, %v558_v25 }
  0xd4   : > { %v591_v14 = vpop.f32.mrf.mxu2 }
  0xd5   : > { %v595_v15 = vpack.c.bf16 %v591_v14, %v591_v14 }
  0xd6   : > { %v521_v16 = vpop.f32.mrf.mxu0 }
  0xd7   : > { %v651_v17 = vunpack.c.l.b16 %v595_v15  ;;  %v556_v30 = vpop.f32.mrf.mxu1 }
  0xd8   : > { %v596_v18 = vld [vmem:[#allocation2] sm:$0xf] }
  0xd9   : > { %v652_v19 = vpack.c.b16 %v651_v17, %v651_v17  ;;  %v603_v20 = vsel %vm598_vm2, %v596_v18, 0  ;;  %v656_v21 = vunpack.c.l.b16 %v596_v18  ;;  %v597_v32 = vld [vmem:[#allocation3] sm:$0xf] }
  0xda   : > { %612 = vmatpush.bf16.xpose.msra.mxu3 %v603_v20  ;;  %v633_v35 = vsel %vm631_vm3, %v597_v32, 0  ;;  %v690_v36 = vunpack.c.l.b16 %v597_v32 }
  0xdb   : > { %v657_v22 = vpack.c.b16 %v656_v21, %v656_v21  ;;  %715 = vrot.lane.b32.xlu2 %v652_v19, %s1589_s11  ;;  %642 = vmatpush.bf16.msrb.mxu0 %v633_v35  ;;  %v1138_v35 = vld [vmem:[#allocation15 + $0x8] sm:$0xff] }
  0xdc   : > { %v593_v23 = vpop.f32.mrf.mxu2  ;;  %v691_v38 = vpack.c.b16 %v690_v36, %v690_v36  ;;  %v1137_v36 = vld [vmem:[#allocation15] sm:$0xff] }
  0xdd   : > { %717 = vrot.lane.b32.xlu1 %v657_v22, %s1589_s11  ;;  %658 = vrot.lane.b32.xlu0 %v657_v22, %s1590_s17 }
  0xe1   : > { %1110 = vmatmul.msk.bf16.vlgmr.msra.gmra.mxu3 %vm598_vm2, %v595_v15 }
  0xe3   : > { %771 = vrot.lane.b32.xlu2 %v652_v19, %s1591_s16 }
  0xe5   : > { %773 = vrot.lane.b32.xlu1 %v657_v22, %s1591_s16  ;;  %653 = vrot.lane.b32.xlu0 %v652_v19, %s1590_s17 }
  0xeb   : > { %692 = vrot.lane.b32.xlu2 %v691_v38, %s1590_s17 }
 0x135   : > { %v716_v31 = vpop.permute.xlu2 %715 }
 0x13d   : > { %v772_v41 = vpop.permute.xlu2 %771 }
 0x145   : > { %v693_v51 = vpop.permute.xlu2 %692 }
 0x146   : > { %v698_v52 = vsel %vm631_vm3, %v693_v51, 0 }
 0x147   : > { %707 = vmatpush.bf16.msrb.mxu2 %v698_v52 }
 0x14f   : > { %v718_v26 = vpop.permute.xlu1 %717  ;;  %v659_v27 = vpop.permute.xlu0 %658 }
 0x150   : > { %v664_v28 = vsel %vm598_vm2, %v659_v27, 0  ;;  %v723_v29 = vsel %vm598_vm2, %v718_v26, 0 }
 0x151   : > { %673 = vmatpush.bf16.xpose.msrb.mxu1 %v664_v28  ;;  %732 = vmatpush.bf16.xpose.msrb.mxu3 %v723_v29 }
 0x157   : > { %v774_v33 = vpop.permute.xlu1 %773  ;;  %v654_v34 = vpop.permute.xlu0 %653 }
 0x158   : > { %v779_v37 = vsel %vm598_vm2, %v774_v33, 0  ;;  %1112 = vmatmul.msk.bf16.vlgmr.msrb.gmra.mxu1 %vm598_vm2, %v654_v34  ;;  %1114 = vmatmul.msk.bf16.vlgmr.msrb.gmra.mxu3 %vm598_vm2, %v716_v31 }
 0x159   : > { %788 = vmatpush.bf16.xpose.msra.mxu1 %v779_v37  ;;  %874 = vmatpush.bf16.msra.mxu3 %v1138_v35 }
 0x15d   : > { %875 = vmatpush.bf16.msra.mxu3 %v1137_v36 }
 0x164   : > { %v614_v39 = vpop.f32.mrf.mxu3 }
 0x165   : > { %v618_v40 = vsel %vm598_vm2, %v614_v39, -inf }
 0x166   : > { %619 = vmax.xlane.f32.xlu1 %v618_v40 }
 0x168   : > { %1116 = vmatmul.msk.bf16.vlgmr.msra.gmra.mxu1 %vm598_vm2, %v772_v41 }
 0x16c   : > { %v616_v42 = vpop.f32.mrf.mxu3 }
 0x17f   : > { %804 = vrot.lane.b32.xlu1 %v691_v38, %s1591_s16 }
 0x1d5   : > { %v675_v43 = vpop.f32.mrf.mxu1 }
 0x1d6   : > { %v679_v44 = vsel %vm598_vm2, %v675_v43, -inf }
 0x1d7   : > { %680 = vmax.xlane.f32.xlu0 %v679_v44 }
 0x1d9   : > { %v620_v45 = vpop.xlane.xlu1 %619 }
 0x1da   : > { %v621_v46 = vsub.f32 %v614_v39, %v620_v45 }
 0x1db   : > { %v734_v47 = vpop.f32.mrf.mxu3 }
 0x1dc   : > { %v622_v48 = vmul.f32 1.442695, %v621_v46  ;;  %v738_v50 = vsel %vm598_vm2, %v734_v47, -inf }
 0x1dd   : > { %v677_v49 = vpop.f32.mrf.mxu1 }
 0x1de   : > { %1261 = vpow2.f32 %v622_v48 }
 0x1df   : > { %739 = vmax.xlane.f32.xlu0 %v738_v50 }
 0x1e3   : > { %v736_v53 = vpop.f32.mrf.mxu3 }
 0x1e4   : > { %v1262_v54 = vpop.eup %1261 }
 0x1e5   : > { %v790_v55 = vpop.f32.mrf.mxu1  ;;  %v624_v56 = vsel %vm598_vm2, %v1262_v54, 0.0  ;;  %v627_v57 = vpack.c.bf16 %v1262_v54, %v1262_v54 }
 0x1e6   : > { %625 = vadd.xlane.f32.xlu1 %v624_v56  ;;  %v794_v58 = vsel %vm598_vm2, %v790_v55, -inf }
 0x1e7   : > { %795 = vmax.xlane.f32.xlu2 %v794_v58  ;;  %1111 = vmatmul.msk.bf16.vlgmr.msrb.gmra.mxu0 %vm598_vm2, %v627_v57 }
 0x1ed   : > { %v792_v59 = vpop.f32.mrf.mxu1 }
 0x1f1   : > { %v805_v60 = vpop.permute.xlu1 %804 }
 0x1f2   : > { %v810_v61 = vsel %vm631_vm3, %v805_v60, 0 }
 0x1f3   : > { %819 = vmatpush.bf16.msra.mxu2 %v810_v61 }
 0x1ff   : > { %748 = vrot.lane.b32.xlu2 %v691_v38, %s1589_s11 }
 0x24a   : > { %v681_v62 = vpop.xlane.xlu0 %680 }
 0x24b   : > { %v682_v63 = vsub.f32 %v675_v43, %v681_v62 }
 0x24d   : > { %v683_v0 = vmul.f32 1.442695, %v682_v63 }
 0x24f   : > { %1263 = vpow2.f32 %v683_v0 }
 0x252   : > { %v740_v1 = vpop.xlane.xlu0 %739 }
 0x253   : > { %v741_v2 = vsub.f32 %v734_v47, %v740_v1  ;;  %v1260_v47 = vld [vmem:[%s1910_s7] ss:$0 sm:$0xff] }
 0x255   : > { %v1264_v3 = vpop.eup %1263  ;;  %v742_v4 = vmul.f32 1.442695, %v741_v2 }
 0x256   : > { %v685_v5 = vsel %vm598_vm2, %v1264_v3, 0.0  ;;  %v688_v6 = vpack.c.bf16 %v1264_v3, %v1264_v3 }
 0x257   : > { %1265 = vpow2.f32 %v742_v4  ;;  %686 = vadd.xlane.f32.xlu0 %v685_v5 }
 0x258   : > { %1113 = vmatmul.msk.bf16.vlgmr.msrb.gmra.mxu2 %vm598_vm2, %v688_v6 }
 0x259   : > { %v626_v37 = vpop.xlane.xlu1 %625 }
 0x25a   : > { %v796_v7 = vpop.xlane.xlu2 %795 }
 0x25b   : > { %v797_v8 = vsub.f32 %v790_v55, %v796_v7 }
 0x25d   : > { %v1266_v9 = vpop.eup %1265  ;;  %v798_v10 = vmul.f32 1.442695, %v797_v8 }
 0x25e   : > { %v744_v11 = vsel %vm598_vm2, %v1266_v9, 0.0  ;;  %v747_v16 = vpack.c.bf16 %v1266_v9, %v1266_v9 }
 0x25f   : > { %1267 = vpow2.f32 %v798_v10  ;;  %745 = vadd.xlane.f32.xlu0 %v744_v11 }
 0x262   : > { %v749_v12 = vpop.permute.xlu2 %748 }
 0x263   : > { %v754_v13 = vsel %vm631_vm3, %v749_v12, 0 }
 0x264   : > { %v644_v14 = vpop.f32.mrf.mxu0  ;;  %763 = vmatpush.bf16.msra.mxu0 %v754_v13 }
 0x265   : > { %v1268_v15 = vpop.eup %1267 }
 0x266   : > { %v803_v17 = vpack.c.bf16 %v1268_v15, %v1268_v15  ;;  %v800_v18 = vsel %vm598_vm2, %v1268_v15, 0.0 }
 0x267   : > { %1115 = vmatmul.msk.bf16.vlgmr.msra.gmra.mxu0 %vm598_vm2, %v747_v16  ;;  %801 = vadd.xlane.f32.xlu0 %v800_v18 }
 0x268   : > { %1117 = vmatmul.msk.bf16.vlgmr.msra.gmra.mxu2 %vm598_vm2, %v803_v17 }
 0x26c   : > { %v646_v19 = vpop.f32.mrf.mxu0 }
 0x2ca   : > { %v687_v20 = vpop.xlane.xlu0 %686 }
 0x2cb   : > { %1269 = vrcp.f32 %v687_v20 }
 0x2d1   : > { %v1270_v22 = vpop.eup %1269 }
 0x2d2   : > { %v746_v21 = vpop.xlane.xlu0 %745 }
 0x2d3   : > { %1271 = vrcp.f32 %v746_v21 }
 0x2d9   : > { %v1272_v27 = vpop.eup %1271 }
 0x2da   : > { %v802_v25 = vpop.xlane.xlu0 %801 }
 0x2db   : > { %v709_v23 = vpop.f32.mrf.mxu2  ;;  %1273 = vrcp.f32 %v802_v25 }
 0x2dc   : > { %v714_v24 = vmul.f32 %v1270_v22, %v709_v23  ;;  %1275 = vrcp.f32 %v626_v37 }
 0x2de   : > { %828 = vrot.lane.b32.xlu2 %v714_v24, %s1592_s5 }
 0x2e1   : > { %v1274_v30 = vpop.eup %1273 }
 0x2e2   : > { %v1276_v39 = vpop.eup %1275 }
 0x2e3   : > { %v711_v26 = vpop.f32.mrf.mxu2  ;;  %v649_v40 = vmul.f32 %v1276_v39, %v644_v14 }
 0x2e4   : > { %v765_v28 = vpop.f32.mrf.mxu0 }
 0x2e5   : > { %v770_v29 = vmul.f32 %v1272_v27, %v765_v28 }
 0x2e7   : > { %832 = vrot.lane.b32.xlu0 %v770_v29, %s1593_s24 }
 0x2eb   : > { %v821_v31 = vpop.f32.mrf.mxu2 }
 0x2ec   : > { %v826_v32 = vmul.f32 %v1274_v30, %v821_v31  ;;  %v767_v33 = vpop.f32.mrf.mxu0 }
 0x2ee   : > { %836 = vrot.lane.b32.xlu2 %v826_v32, %s1594_s9 }
 0x2f3   : > { %v823_v34 = vpop.f32.mrf.mxu2 }
 0x338   : > { %v829_v38 = vpop.permute.xlu2 %828 }
 0x339   : > { %v839_v41 = vsel %vm598_vm2, %v649_v40, %v829_v38 }
 0x348   : > { %v837_v43 = vpop.permute.xlu2 %836 }
 0x359   : > { %v833_v42 = vpop.permute.xlu0 %832 }
 0x35a   : > { %v841_v44 = vsel %vm840_vm4, %v839_v41, %v833_v42 }
 0x35b   : > { %v843_v45 = vsel %vm842_vm5, %v841_v44, %v837_v43 }
 0x35c   : > { %v844_v46 = vpack.c.bf16 %v843_v45, %v843_v45 }
 0x35e   : > { %1126 = vmatmul.msk.bf16.vlgmr.msra.gmra.mxu3 %vm506_vm0, %v844_v46 }
 0x3e1   : > { %v877_v48 = vpop.f32.mrf.mxu3 }
 0x3e2   : > { %v878_v49 = vadd.f32 %v1260_v47, %v877_v48 }
 0x3e4   : > { %881 = vst.msk [vmem:[%s480_s12] sm:$0xff] %vm506_vm0, %v878_v49 }
 0x3e5   : > { %1514 = shalt.err (!%p1511_p13)
}
 0x3e6   : > { %1161 = dma.vmem_to_hbm [thread:$0]  (%p1728_p2), %s897_s14, 128, %s899_s18, %s883_s6  }
 0x3e9   : > { %v879_v50 = vpop.f32.mrf.mxu3 }
 0x3ea PF: > { %s1950_s11 = sld [smem:[#allocation23_spill]]  ;;  %s910_s17 = sand.u32 1, %s1561_s27  }
 0x3eb   : > { %p1187_p0 = pnand %p1067_p6, %p1735_p7  ;;  %s911_s16 = scalar_lea.sflag [#allocation6], %s910_s17 }
 0x3ed   : > { %p1188_p4 = pneg %p1187_p0 }
 0x3ef   : > { %1556 = dma.done.wait (%p1188_p4), %s911_s16, 128  }
 0x3f0   : > { %1558 = vsyncadd (%p1188_p4), %s911_s16, 4294967168  ;;  %s29_s10 = sadd.s32 1, %s1950_s11   ;;  %s1951_s19 = sld [smem:[#allocation25_spill]] }
 0x3f1   : > { %p26_p9 = scmp.ge.s32.totalorder %s29_s10, 4   ;;  %s1952_s30 = sld [smem:[#allocation22_spill]] }
 0x3f2   : > { %s1953_s9 = sld [smem:[#allocation24_spill]]  ;;  %s1954_s27 = smov %s1565_s28 }
 0x3f3   : > { %s1955_s28 = smov %s1569_s29  ;;  %28 = sbr.rel (!%p26_p9) target bundleno = 17 (0x11), region = 141 }
 0x3f6   : > { %s1956_s29 = smov %s1951_s19 }
 0x3f8   :  { %917 = vsyncpa [#allocation5], 1 }
 0x3f9   :  { %919 = vsyncpa [#allocation5 + $0x1], 1 }
 0x3fa   :  { %920 = vsyncpa [#allocation8], 1 }
 0x3fb   :  { %922 = vsyncpa [#allocation8 + $0x1], 1 }
 0x3fc   :  { %923 = vsyncpa [#allocation11], 1 }
 0x3fd   :  { %924 = vsyncpa [#allocation14], 1 }
 0x3fe   :  { %925 = vsyncpa [#allocation6], 1 }
 0x3ff   :  { %927 = vsyncpa [#allocation6 + $0x1], 1 }

</bundles_post_ra>
